<compile_context>
chip_gen: v7x
topology: tpu7x:2x2x1
jax: 0.10.0
libtpu: 0.0.40
codegen_flags: <defaults>
</compile_context>

<pallas_src>
import jax
import jax.numpy as jnp
from jax.experimental import pallas as pl
from jax.experimental.pallas import tpu as pltpu

CHANNELS = 1
IMG_SIZE = 28
IN_FEATURES = CHANNELS * IMG_SIZE * IMG_SIZE      # 784
IN_PAD = 896                                      # 7 * 128 (lane-aligned K)
H1 = 512
H2 = 256
OUT = 1
TB_MAX = 512                                      # max batch tile (rows)


def _round_up(x, m):
    return (x + m - 1) // m * m


def _leaky_relu(x, slope=0.2):
    return jnp.where(x > 0, x, slope * x)


def _compute_tiling(b):
    """Pick (batch tile, padded batch).  tb is a multiple of 16 (bf16 sublane
    tile) for small batches and of 128 for b >= 128; for batches that would fit
    a single max-size tile we still keep >=2 grid steps (v7x dual-TC)."""
    if b < 128:
        tb = _round_up(max(b, 16), 16)
        return tb, tb
    b_pad = _round_up(b, 128)
    if b_pad <= TB_MAX:
        if b_pad >= 256:
            if (b_pad // 2) % 128 != 0:
                b_pad = _round_up(b_pad, 256)
            tb = b_pad // 2                      # 2 grid steps
        else:
            tb = b_pad                           # 128 rows: single step
    else:
        tb = TB_MAX
        b_pad = _round_up(b, tb)                 # >= 2 grid steps
    return tb, b_pad


def discriminator_kernel(x_ref, w1_ref, b1_ref, w2_ref, b2_ref, w3_ref, b3_ref,
                         out_ref):
    """(TB,896)bf16 @ (896,512) -> LeakyReLU -> @ (512,256) -> LeakyReLU ->
    w3p(8,256) @ h2^T (MXU) -> row 0 -> Sigmoid, stored lane-dense as (1,TB)."""
    x = x_ref[...]                                             # (TB, IN_PAD) bf16

    # Layer 1: MXU matmul, f32 accumulate; bias/activation in f32.
    h1 = jnp.dot(x, w1_ref[...], preferred_element_type=jnp.float32) + b1_ref[...]
    h1 = _leaky_relu(h1)

    # Layer 2: cast operand only (keep activation math in f32).
    h2 = jnp.dot(h1.astype(jnp.bfloat16), w2_ref[...],
                 preferred_element_type=jnp.float32) + b2_ref[...]
    h2 = _leaky_relu(h2)

    # Layer 3 (N=1): MXU matmul producing a lane-dense row directly.
    #   w3p (8,256) [row 0 = real weights, rows 1-7 zero]  x  h2^T (256, TB)
    logits8 = jax.lax.dot_general(
        w3_ref[...], h2.astype(jnp.bfloat16),
        dimension_numbers=(((1,), (1,)), ((), ())),
        preferred_element_type=jnp.float32)                    # (8, TB)
    logits = logits8[0:1, :] + b3_ref[...]                     # (1, TB)

    # Sigmoid via EUP exp + approx reciprocal (epilogue stays off the VALU).
    out_ref[...] = pl.reciprocal(1.0 + jnp.exp(-logits),
                                 approx=True).astype(out_ref.dtype)


@jax.jit
def discriminator_forward(x, kparams):
    """x: (B, C, H, W) float32 (NCHW, like PyTorch).  Returns (B, 1) validity."""
    w1p, b1, w2, b2, w3p, b3 = kparams

    b = x.shape[0]
    tb, b_pad = _compute_tiling(b)

    # Cast first, then a single bf16 pad (batch rows + 784->896 lane pad).
    x_flat = x.reshape(b, -1).astype(jnp.bfloat16)             # (B, 784) bf16
    x_flat = jnp.pad(x_flat, ((0, b_pad - b), (0, IN_PAD - IN_FEATURES)))

    grid = (b_pad // tb,)

    out = pl.pallas_call(
        discriminator_kernel,
        out_shape=jax.ShapeDtypeStruct((1, b_pad), jnp.float32),
        grid_spec=pltpu.PrefetchScalarGridSpec(
            num_scalar_prefetch=0,
            grid=grid,
            in_specs=[
                # batch-tiled input (double-buffered by the pipeline)
                pl.BlockSpec((tb, IN_PAD), lambda i: (i, 0)),
                # weights / biases: constant index_map -> resident in VMEM
                pl.BlockSpec((IN_PAD, H1), lambda i: (0, 0)),
                pl.BlockSpec((1, H1), lambda i: (0, 0)),
                pl.BlockSpec((H1, H2), lambda i: (0, 0)),
                pl.BlockSpec((1, H2), lambda i: (0, 0)),
                pl.BlockSpec((8, H2), lambda i: (0, 0)),
                pl.BlockSpec((1, 1), lambda i: (0, 0)),
            ],
            # lane-dense output row: unmasked full-lane stores
            out_specs=pl.BlockSpec((1, tb), lambda i: (0, i)),
        ),
        compiler_params=pltpu.CompilerParams(
            dimension_semantics=("parallel",),
            vmem_limit_bytes=16 * 1024 * 1024,
        ),
    )(x_flat, w1p, b1, w2, b2, w3p, b3)

    return out[0, :b].reshape(b, OUT)


def init_params(key):
    """PyTorch-style nn.Linear init; weights stored transposed (in, out), f32."""
    def linear(key, fan_in, fan_out):
        kw, kb = jax.random.split(key)
        bound = 1.0 / jnp.sqrt(fan_in)
        w = jax.random.uniform(kw, (fan_in, fan_out), jnp.float32, -bound, bound)
        bias = jax.random.uniform(kb, (1, fan_out), jnp.float32, -bound, bound)
        return w, bias

    k1, k2, k3 = jax.random.split(key, 3)
    w1, b1 = linear(k1, IN_FEATURES, H1)
    w2, b2 = linear(k2, H1, H2)
    w3, b3 = linear(k3, H2, OUT)
    return (w1, b1, w2, b2, w3, b3)


def prepare_kernel_params(params):
    """Pad/cast the f32 PyTorch-layout params into the kernel layout (done once)."""
    w1, b1, w2, b2, w3, b3 = params
    w1p = (jnp.zeros((IN_PAD, H1), jnp.float32)
           .at[:IN_FEATURES].set(w1).astype(jnp.bfloat16))     # (896, 512) bf16
    w2b = w2.astype(jnp.bfloat16)                              # (512, 256) bf16
    w3p = (jnp.zeros((8, H2), jnp.float32)
           .at[0].set(w3.reshape(-1)).astype(jnp.bfloat16))    # (8, 256) bf16
    b3r = b3.reshape(1, 1).astype(jnp.float32)                 # (1, 1) f32
    return (w1p, b1.astype(jnp.float32), w2b, b2.astype(jnp.float32), w3p, b3r)


def reference_forward(x, params):
    """Pure-JAX f32 reference matching the PyTorch module."""
    w1, b1, w2, b2, w3, b3 = params
    h = x.reshape(x.shape[0], -1)
    h = jax.nn.leaky_relu(h @ w1 + b1, 0.2)
    h = jax.nn.leaky_relu(h @ w2 + b2, 0.2)
    return jax.nn.sigmoid(h @ w3 + b3)


if __name__ == "__main__":
    key = jax.random.PRNGKey(0)
    k_params, k_x = jax.random.split(key)

    params = init_params(k_params)
    kparams = prepare_kernel_params(params)

    # Small batch, MNIST-like image shape implied by the module.
    x = jax.random.normal(k_x, (8, CHANNELS, IMG_SIZE, IMG_SIZE), jnp.float32)

    out = discriminator_forward(x, kparams)
    out = jax.block_until_ready(out)

    ref = reference_forward(x, params)
    assert out.shape == (8, 1)
    # bf16 matmul operands + approx reciprocal => looser tolerance than pure f32.
    assert jnp.allclose(out, ref, atol=1e-2, rtol=1e-2), (
        f"max abs err {jnp.max(jnp.abs(out - ref))}")

    print("KERNEL_OK")
</pallas_src>

<mosaic_0001>
module attributes {stable_mosaic.version = 11 : i64} {
  func.func @discriminator_kernel(%arg0: i32, %arg1: memref<16x896xbf16, #tpu.memory_space<vmem>>, %arg2: memref<896x512xbf16, #tpu.memory_space<vmem>>, %arg3: memref<1x512xf32, #tpu.memory_space<vmem>>, %arg4: memref<512x256xbf16, #tpu.memory_space<vmem>>, %arg5: memref<1x256xf32, #tpu.memory_space<vmem>>, %arg6: memref<8x256xbf16, #tpu.memory_space<vmem>>, %arg7: memref<1x1xf32, #tpu.memory_space<vmem>>, %arg8: memref<1x16xf32, #tpu.memory_space<vmem>>) attributes {dimension_semantics = [#tpu.dimension_semantics<parallel>], iteration_bounds = array<i64: 1>, scalar_prefetch = 0 : i64, scratch_operands = 0 : i64, tpu.core_type = #tpu.core_type<tc>, window_params = [{transform_indices = @transform_0, window_bounds = array<i64: 16, 896>}, {pipeline_mode = #tpu.pipeline_mode<synchronous>, transform_indices = @transform_1, window_bounds = array<i64: 896, 512>}, {pipeline_mode = #tpu.pipeline_mode<synchronous>, transform_indices = @transform_2, window_bounds = array<i64: 1, 512>}, {pipeline_mode = #tpu.pipeline_mode<synchronous>, transform_indices = @transform_3, window_bounds = array<i64: 512, 256>}, {pipeline_mode = #tpu.pipeline_mode<synchronous>, transform_indices = @transform_4, window_bounds = array<i64: 1, 256>}, {pipeline_mode = #tpu.pipeline_mode<synchronous>, transform_indices = @transform_5, window_bounds = array<i64: 8, 256>}, {pipeline_mode = #tpu.pipeline_mode<synchronous>, transform_indices = @transform_6, window_bounds = array<i64: 1, 1>}, {transform_indices = @transform_7, window_bounds = array<i64: 1, 16>}]} {
    %c0 = arith.constant 0 : index
    %c0_0 = arith.constant 0 : index
    %0 = vector.load %arg1[%c0, %c0_0] : memref<16x896xbf16, #tpu.memory_space<vmem>>, vector<16x896xbf16>
    %c0_1 = arith.constant 0 : index
    %c0_2 = arith.constant 0 : index
    %1 = vector.load %arg2[%c0_1, %c0_2] : memref<896x512xbf16, #tpu.memory_space<vmem>>, vector<896x512xbf16>
    %cst = arith.constant dense<0.000000e+00> : vector<16x512xf32>
    %2 = tpu.matmul %0, %1, %cst {dimension_numbers = #tpu.dot_dimension_numbers<[1], [0], [0], [1], [0, 0, 1, 1], [], []>} : vector<16x896xbf16>, vector<896x512xbf16>, vector<16x512xf32> -> vector<16x512xf32>
    %c0_3 = arith.constant 0 : index
    %c0_4 = arith.constant 0 : index
    %3 = vector.load %arg3[%c0_3, %c0_4] : memref<1x512xf32, #tpu.memory_space<vmem>>, vector<1x512xf32>
    %4 = vector.broadcast %3 : vector<1x512xf32> to vector<16x512xf32>
    %5 = arith.addf %2, %4 : vector<16x512xf32>
    %cst_5 = arith.constant 0.000000e+00 : f32
    %6 = vector.broadcast %cst_5 : f32 to vector<16x512xf32>
    %7 = arith.cmpf ogt, %5, %6 : vector<16x512xf32>
    %cst_6 = arith.constant 2.000000e-01 : f32
    %8 = vector.broadcast %cst_6 : f32 to vector<16x512xf32>
    %9 = arith.mulf %8, %5 : vector<16x512xf32>
    %10 = arith.select %7, %5, %9 : vector<16x512xi1>, vector<16x512xf32>
    %11 = arith.truncf %10 : vector<16x512xf32> to vector<16x512xbf16>
    %c0_7 = arith.constant 0 : index
    %c0_8 = arith.constant 0 : index
    %12 = vector.load %arg4[%c0_7, %c0_8] : memref<512x256xbf16, #tpu.memory_space<vmem>>, vector<512x256xbf16>
    %cst_9 = arith.constant dense<0.000000e+00> : vector<16x256xf32>
    %13 = tpu.matmul %11, %12, %cst_9 {dimension_numbers = #tpu.dot_dimension_numbers<[1], [0], [0], [1], [0, 0, 1, 1], [], []>} : vector<16x512xbf16>, vector<512x256xbf16>, vector<16x256xf32> -> vector<16x256xf32>
    %c0_10 = arith.constant 0 : index
    %c0_11 = arith.constant 0 : index
    %14 = vector.load %arg5[%c0_10, %c0_11] : memref<1x256xf32, #tpu.memory_space<vmem>>, vector<1x256xf32>
    %15 = vector.broadcast %14 : vector<1x256xf32> to vector<16x256xf32>
    %16 = arith.addf %13, %15 : vector<16x256xf32>
    %cst_12 = arith.constant 0.000000e+00 : f32
    %17 = vector.broadcast %cst_12 : f32 to vector<16x256xf32>
    %18 = arith.cmpf ogt, %16, %17 : vector<16x256xf32>
    %cst_13 = arith.constant 2.000000e-01 : f32
    %19 = vector.broadcast %cst_13 : f32 to vector<16x256xf32>
    %20 = arith.mulf %19, %16 : vector<16x256xf32>
    %21 = arith.select %18, %16, %20 : vector<16x256xi1>, vector<16x256xf32>
    %c0_14 = arith.constant 0 : index
    %c0_15 = arith.constant 0 : index
    %22 = vector.load %arg6[%c0_14, %c0_15] : memref<8x256xbf16, #tpu.memory_space<vmem>>, vector<8x256xbf16>
    %23 = arith.truncf %21 : vector<16x256xf32> to vector<16x256xbf16>
    %cst_16 = arith.constant dense<0.000000e+00> : vector<8x16xf32>
    %24 = tpu.matmul %22, %23, %cst_16 {dimension_numbers = #tpu.dot_dimension_numbers<[1], [1], [0], [0], [0, 0, 1, 0], [], []>} : vector<8x256xbf16>, vector<16x256xbf16>, vector<8x16xf32> -> vector<8x16xf32>
    %25 = vector.extract_strided_slice %24 {offsets = [0, 0], sizes = [1, 16], strides = [1, 1]} : vector<8x16xf32> to vector<1x16xf32>
    %c0_17 = arith.constant 0 : index
    %c0_18 = arith.constant 0 : index
    %26 = vector.load %arg7[%c0_17, %c0_18] : memref<1x1xf32, #tpu.memory_space<vmem>>, vector<1x1xf32>
    %27 = vector.broadcast %26 : vector<1x1xf32> to vector<1x16xf32>
    %28 = arith.addf %25, %27 : vector<1x16xf32>
    %cst_19 = arith.constant 0.000000e+00 : f32
    %29 = vector.broadcast %cst_19 : f32 to vector<1x16xf32>
    %30 = arith.subf %29, %28 : vector<1x16xf32>
    %31 = math.exp %30 : vector<1x16xf32>
    %cst_20 = arith.constant 1.000000e+00 : f32
    %32 = vector.broadcast %cst_20 : f32 to vector<1x16xf32>
    %33 = arith.addf %32, %31 : vector<1x16xf32>
    %34 = tpu.reciprocal %33 {approx = true} : vector<1x16xf32> -> vector<1x16xf32>
    %c0_21 = arith.constant 0 : index
    %c0_22 = arith.constant 0 : index
    %35 = vector.load %arg8[%c0_21, %c0_22] : memref<1x16xf32, #tpu.memory_space<vmem>>, vector<1x16xf32>
    tpu.vector_store %arg8[%c0_21, %c0_22], %34 {strides = array<i32>} : memref<1x16xf32, #tpu.memory_space<vmem>>, vector<1x16xf32>,
    return
  }
  func.func @transform_0(%arg0: i32) -> (i32, i32) {
    %c0_i32 = arith.constant 0 : i32
    %c0_i32_0 = arith.constant 0 : i32
    return %arg0, %c0_i32 : i32, i32
  }
  func.func @transform_1(%arg0: i32) -> (i32, i32) {
    %c0_i32 = arith.constant 0 : i32
    %c0_i32_0 = arith.constant 0 : i32
    %c0_i32_1 = arith.constant 0 : i32
    return %c0_i32, %c0_i32_0 : i32, i32
  }
  func.func @transform_2(%arg0: i32) -> (i32, i32) {
    %c0_i32 = arith.constant 0 : i32
    %c0_i32_0 = arith.constant 0 : i32
    %c0_i32_1 = arith.constant 0 : i32
    return %c0_i32, %c0_i32_0 : i32, i32
  }
  func.func @transform_3(%arg0: i32) -> (i32, i32) {
    %c0_i32 = arith.constant 0 : i32
    %c0_i32_0 = arith.constant 0 : i32
    %c0_i32_1 = arith.constant 0 : i32
    return %c0_i32, %c0_i32_0 : i32, i32
  }
  func.func @transform_4(%arg0: i32) -> (i32, i32) {
    %c0_i32 = arith.constant 0 : i32
    %c0_i32_0 = arith.constant 0 : i32
    %c0_i32_1 = arith.constant 0 : i32
    return %c0_i32, %c0_i32_0 : i32, i32
  }
  func.func @transform_5(%arg0: i32) -> (i32, i32) {
    %c0_i32 = arith.constant 0 : i32
    %c0_i32_0 = arith.constant 0 : i32
    %c0_i32_1 = arith.constant 0 : i32
    return %c0_i32, %c0_i32_0 : i32, i32
  }
  func.func @transform_6(%arg0: i32) -> (i32, i32) {
    %c0_i32 = arith.constant 0 : i32
    %c0_i32_0 = arith.constant 0 : i32
    %c0_i32_1 = arith.constant 0 : i32
    return %c0_i32, %c0_i32_0 : i32, i32
  }
  func.func @transform_7(%arg0: i32) -> (i32, i32) {
    %c0_i32 = arith.constant 0 : i32
    %c0_i32_0 = arith.constant 0 : i32
    return %c0_i32, %arg0 : i32, i32
  }
}

</mosaic_0001>

<bundles_post_ra>
// kernel: discriminator_forward.1
= control target key start
LH: loop header
LB: loop body
LE: loop exit
PB: predicated region body
PF: predicated region fallthrough
CT: control target
= control target key end

     0   :  { %s3538_s0 = inlined_call_operand.vmem [shape: bf16[16,896], index: 0, kind: input, shape index: {}]   ;;  %s3539_s1 = inlined_call_operand.hbm [shape: bf16[896,512], index: 1, kind: input, shape index: {}]   ;;  %s3540_s2 = inlined_call_operand.vmem [shape: f32[1,512], index: 2, kind: input, shape index: {}]   ;;  %s3541_s3 = inlined_call_operand.vmem [shape: bf16[512,256], index: 3, kind: input, shape index: {}]   ;;  %s3542_s4 = inlined_call_operand.vmem [shape: f32[1,256], index: 4, kind: input, shape index: {}]   ;;  %s3543_s5 = inlined_call_operand.vmem [shape: bf16[8,256], index: 5, kind: input, shape index: {}]   ;;  %s3544_s6 = inlined_call_operand.<no memory space> [shape: f32[1,1], index: 6, kind: input, shape index: {}]   ;;  %s3545_s7 = inlined_call_operand.vmem [shape: f32[1,16], index: 7, kind: output, shape index: {}]  }
   0x1   :  { %v12_v0 = vstv %s3544_s6 }
   0x2   :  { %13 = vst [vmem:[#allocation2] sm:$0x1] %v12_v0 }
   0x3   :  { %14 = vsyncpa [#allocation4], 0  ;;  %s3206_s26 = smov [#allocation3]   ;;  %s3182_s30 = scalar_lea.hbm %s3539_s1, 28672 }
   0x4   :  { %s22_s27 = sshll.u32 %s3206_s26, 4  ;;  %p3183_p0 = scmp.ne.s32.totalorder %s3539_s1, %s3182_s30  ;;  %s23_s27 = int_to_ptr.vmem [resolvable:$true] %s22_s27 }
   0x5   :  { %p3186_p1 = scmp.lt.u32.totalorder %s3182_s30, %s3539_s1 }
   0x7   :  { %p3188_p2 = pnand %p3186_p1, %p3183_p0 }
   0x9   :  { %3191 = shalt.err (!%p3188_p2)
}
   0xa   :  { %s3192_s6 = scalar_lea.vmem %s23_s27, 28672  ;;  %p3197_p4 = scmp.lt.s32.totalorder %s23_s27, %s23_s27 }
   0xb   :  { %p3193_p3 = scmp.ne.s32.totalorder %s23_s27, %s3192_s6  ;;  %p3198_p5 = scmp.lt.s32.totalorder %s3192_s6, %s3192_s6 }
   0xd   :  { %p3199_p6 = por %p3198_p5, %p3197_p4 }
   0xf   :  { %p3200_p7 = pnand %p3199_p6, %p3193_p3 }
  0x11   :  { %3203 = shalt.err (!%p3200_p7)
}
  0x12   :  { %s3207_s12 = smov 256   ;;  %s3208_s13 = smov 16  }
  0x13   :  { %28 = dma.hbm_to_vmem [thread:$0]  %s3539_s1, 28672, %s23_s27, [#allocation4], %s3207_s12, %s3207_s12, %s3208_s13  }
  0x14   :  { %3204 = dma.done.wait [#allocation4], 28672  }
  0x15   :  { %3205 = vsyncadd [#allocation4], 4294938624  ;;  %v2734_v1 = vld [vmem:[#allocation3 + $0x4] ss:$16 sps:$4 sm:$0xff]   ;;  %v2738_v3 = vld [vmem:[#allocation3] ss:$16 sps:$4 sm:$0xff]  }
  0x16   :  { %v2736_v2 = vld [vmem:[#allocation3 + $0x204] ss:$16 sps:$4 sm:$0xff]   ;;  %1453 = vmatprep.subr.bf16.mxu1 %v2734_v1  ;;  %v2739_v4 = vld [vmem:[#allocation3 + $0x200] ss:$16 sps:$4 sm:$0xff]   ;;  %v3209_v39 = vmov 0   ;;  %vm2385_vm12 = vcmask 122880  }
  0x17   :  { %1496 = vmatprep.subr.bf16.mxu0 %v2736_v2  ;;  %v2740_v5 = vld [vmem:[#allocation3 + $0x24] ss:$16 sps:$4 sm:$0xff]   ;;  %1454 = vmatpush1.bf16.msra.mxu1 %v2738_v3  ;;  %v2744_v7 = vld [vmem:[#allocation3 + $0x20] ss:$16 sps:$4 sm:$0xff]  }
  0x18   :  { %1497 = vmatpush1.bf16.msra.mxu0 %v2739_v4  ;;  %v2742_v6 = vld [vmem:[#allocation3 + $0x224] ss:$16 sps:$4 sm:$0xff]   ;;  %1455 = vmatprep.subr.bf16.mxu1 %v2740_v5  ;;  %v2745_v8 = vld [vmem:[#allocation3 + $0x220] ss:$16 sps:$4 sm:$0xff]   ;;  %v2841_v5 = vld [vmem:[#allocation3 + $0xc] ss:$16 sps:$4 sm:$0xff]  }
  0x19   :  { %1498 = vmatprep.subr.bf16.mxu0 %v2742_v6  ;;  %v2746_v9 = vld [vmem:[#allocation3 + $0x44] ss:$16 sps:$4 sm:$0xff]   ;;  %v2750_v11 = vld [vmem:[#allocation3 + $0x40] ss:$16 sps:$4 sm:$0xff]   ;;  %2733 = vset.pattern.permute.xlu0 %v3209_v39 }
  0x1a   :  { %v2748_v10 = vld [vmem:[#allocation3 + $0x244] ss:$16 sps:$4 sm:$0xff]   ;;  %v2751_v12 = vld [vmem:[#allocation3 + $0x240] ss:$16 sps:$4 sm:$0xff]  }
  0x1b   :  { %1456 = vmatpush1.bf16.msra.mxu1 %v2744_v7  ;;  %v2752_v13 = vld [vmem:[#allocation3 + $0x64] ss:$16 sps:$4 sm:$0xff]   ;;  %v2756_v15 = vld [vmem:[#allocation3 + $0x60] ss:$16 sps:$4 sm:$0xff]  }
  0x1c   :  { %1499 = vmatpush1.bf16.msra.mxu0 %v2745_v8  ;;  %1457 = vmatprep.subr.bf16.mxu1 %v2746_v9  ;;  %v2754_v14 = vld [vmem:[#allocation3 + $0x264] ss:$16 sps:$4 sm:$0xff]   ;;  %v2757_v16 = vld [vmem:[#allocation3 + $0x260] ss:$16 sps:$4 sm:$0xff]   ;;  %v2839_v9 = vld [vmem:[#allocation3 + $0x8] ss:$16 sps:$4 sm:$0xff]  }
  0x1d   :  { %1500 = vmatprep.subr.bf16.mxu0 %v2748_v10  ;;  %v2758_v17 = vld [vmem:[#allocation3 + $0x84] ss:$16 sps:$4 sm:$0xff]   ;;  %v2762_v19 = vld [vmem:[#allocation3 + $0x80] ss:$16 sps:$4 sm:$0xff]  }
  0x1e   :  { %v2760_v18 = vld [vmem:[#allocation3 + $0x284] ss:$16 sps:$4 sm:$0xff]   ;;  %v2763_v20 = vld [vmem:[#allocation3 + $0x280] ss:$16 sps:$4 sm:$0xff]  }
  0x1f   :  { %1458 = vmatpush1.bf16.msra.mxu1 %v2750_v11  ;;  %v2764_v21 = vld [vmem:[#allocation3 + $0xa4] ss:$16 sps:$4 sm:$0xff]   ;;  %v2768_v23 = vld [vmem:[#allocation3 + $0xa0] ss:$16 sps:$4 sm:$0xff]   ;;  %v2847_v11 = vld [vmem:[#allocation3 + $0x2c] ss:$16 sps:$4 sm:$0xff]  }
  0x20   :  { %1501 = vmatpush1.bf16.msra.mxu0 %v2751_v12  ;;  %1459 = vmatprep.subr.bf16.mxu1 %v2752_v13  ;;  %v2766_v22 = vld [vmem:[#allocation3 + $0x2a4] ss:$16 sps:$4 sm:$0xff]   ;;  %v2769_v24 = vld [vmem:[#allocation3 + $0x2a0] ss:$16 sps:$4 sm:$0xff]   ;;  %v2845_v13 = vld [vmem:[#allocation3 + $0x28] ss:$16 sps:$4 sm:$0xff]  }
  0x21   :  { %1502 = vmatprep.subr.bf16.mxu0 %v2754_v14  ;;  %v2770_v25 = vld [vmem:[#allocation3 + $0xc4] ss:$16 sps:$4 sm:$0xff]   ;;  %v2774_v27 = vld [vmem:[#allocation3 + $0xc0] ss:$16 sps:$4 sm:$0xff]  }
  0x22   :  { %v2772_v26 = vld [vmem:[#allocation3 + $0x2c4] ss:$16 sps:$4 sm:$0xff]   ;;  %v2775_v28 = vld [vmem:[#allocation3 + $0x2c0] ss:$16 sps:$4 sm:$0xff]  }
  0x23   :  { %1460 = vmatpush1.bf16.msra.mxu1 %v2756_v15  ;;  %v2776_v29 = vld [vmem:[#allocation3 + $0xe4] ss:$16 sps:$4 sm:$0xff]   ;;  %v2780_v31 = vld [vmem:[#allocation3 + $0xe0] ss:$16 sps:$4 sm:$0xff]   ;;  %v2853_v15 = vld [vmem:[#allocation3 + $0x4c] ss:$16 sps:$4 sm:$0xff]  }
  0x24   :  { %1503 = vmatpush1.bf16.msra.mxu0 %v2757_v16  ;;  %1461 = vmatprep.subr.bf16.mxu1 %v2758_v17  ;;  %v2778_v30 = vld [vmem:[#allocation3 + $0x2e4] ss:$16 sps:$4 sm:$0xff]   ;;  %v2781_v32 = vld [vmem:[#allocation3 + $0x2e0] ss:$16 sps:$4 sm:$0xff]   ;;  %v2851_v17 = vld [vmem:[#allocation3 + $0x48] ss:$16 sps:$4 sm:$0xff]  }
  0x25   :  { %1504 = vmatprep.subr.bf16.mxu0 %v2760_v18  ;;  %v2782_v33 = vld [vmem:[#allocation3 + $0x104] ss:$16 sps:$4 sm:$0xff]   ;;  %v2786_v35 = vld [vmem:[#allocation3 + $0x100] ss:$16 sps:$4 sm:$0xff]  }
  0x26   :  { %v2784_v34 = vld [vmem:[#allocation3 + $0x304] ss:$16 sps:$4 sm:$0xff]   ;;  %v2787_v36 = vld [vmem:[#allocation3 + $0x300] ss:$16 sps:$4 sm:$0xff]  }
  0x27   :  { %1462 = vmatpush1.bf16.msra.mxu1 %v2762_v19  ;;  %v2788_v37 = vld [vmem:[#allocation3 + $0x124] ss:$16 sps:$4 sm:$0xff]   ;;  %v2792_v40 = vld [vmem:[#allocation3 + $0x120] ss:$16 sps:$4 sm:$0xff]   ;;  %v2859_v19 = vld [vmem:[#allocation3 + $0x6c] ss:$16 sps:$4 sm:$0xff]  }
  0x28   :  { %1505 = vmatpush1.bf16.msra.mxu0 %v2763_v20  ;;  %1463 = vmatprep.subr.bf16.mxu1 %v2764_v21  ;;  %v2790_v38 = vld [vmem:[#allocation3 + $0x324] ss:$16 sps:$4 sm:$0xff]   ;;  %v2793_v41 = vld [vmem:[#allocation3 + $0x320] ss:$16 sps:$4 sm:$0xff]   ;;  %v2857_v21 = vld [vmem:[#allocation3 + $0x68] ss:$16 sps:$4 sm:$0xff]  }
  0x29   :  { %1506 = vmatprep.subr.bf16.mxu0 %v2766_v22  ;;  %v2794_v42 = vld [vmem:[#allocation3 + $0x144] ss:$16 sps:$4 sm:$0xff]   ;;  %v2798_v44 = vld [vmem:[#allocation3 + $0x140] ss:$16 sps:$4 sm:$0xff]  }
  0x2a   :  { %v2796_v43 = vld [vmem:[#allocation3 + $0x344] ss:$16 sps:$4 sm:$0xff]   ;;  %v2799_v45 = vld [vmem:[#allocation3 + $0x340] ss:$16 sps:$4 sm:$0xff]  }
  0x2b   :  { %1464 = vmatpush1.bf16.msra.mxu1 %v2768_v23  ;;  %v2800_v46 = vld [vmem:[#allocation3 + $0x164] ss:$16 sps:$4 sm:$0xff]   ;;  %v2804_v48 = vld [vmem:[#allocation3 + $0x160] ss:$16 sps:$4 sm:$0xff]   ;;  %v2865_v23 = vld [vmem:[#allocation3 + $0x8c] ss:$16 sps:$4 sm:$0xff]  }
  0x2c   :  { %1507 = vmatpush1.bf16.msra.mxu0 %v2769_v24  ;;  %1465 = vmatprep.subr.bf16.mxu1 %v2770_v25  ;;  %v2802_v47 = vld [vmem:[#allocation3 + $0x364] ss:$16 sps:$4 sm:$0xff]   ;;  %v2805_v49 = vld [vmem:[#allocation3 + $0x360] ss:$16 sps:$4 sm:$0xff]   ;;  %v2863_v25 = vld [vmem:[#allocation3 + $0x88] ss:$16 sps:$4 sm:$0xff]  }
  0x2d   :  { %1508 = vmatprep.subr.bf16.mxu0 %v2772_v26  ;;  %v2806_v50 = vld [vmem:[#allocation3 + $0x184] ss:$16 sps:$4 sm:$0xff]   ;;  %v2810_v54 = vld [vmem:[#allocation3 + $0x180] ss:$16 sps:$4 sm:$0xff]  }
  0x2e   :  { %v2832_v51 = vld [vmem:[%s3538_s0 + $0x4] ss:$28 sps:$4 sm:$0xff]   ;;  %v3272_v53 = vld [vmem:[%s3538_s0 + $0xc] ss:$28 sps:$4 sm:$0xff]  }
  0x2f   :  { %1466 = vmatpush1.bf16.msra.mxu1 %v2774_v27  ;;  %v2808_v52 = vld [vmem:[#allocation3 + $0x384] ss:$16 sps:$4 sm:$0xff]   ;;  %1485 = vmatprep.mubr.bf16.mxu1 %v2832_v51  ;;  %v2811_v55 = vld [vmem:[#allocation3 + $0x380] ss:$16 sps:$4 sm:$0xff]   ;;  %v2871_v27 = vld [vmem:[#allocation3 + $0xac] ss:$16 sps:$4 sm:$0xff]  }
  0x30   :  { %1509 = vmatpush1.bf16.msra.mxu0 %v2775_v28  ;;  %1467 = vmatprep.subr.bf16.mxu1 %v2776_v29  ;;  %v2812_v56 = vld [vmem:[#allocation3 + $0x1a4] ss:$16 sps:$4 sm:$0xff]   ;;  %v2816_v58 = vld [vmem:[#allocation3 + $0x1a0] ss:$16 sps:$4 sm:$0xff]   ;;  %v2869_v29 = vld [vmem:[#allocation3 + $0xa8] ss:$16 sps:$4 sm:$0xff]  }
  0x31   :  { %1510 = vmatprep.subr.bf16.mxu0 %v2778_v30  ;;  %1528 = vmatprep.mubr.bf16.mxu0 %v3272_v53  ;;  %v2814_v57 = vld [vmem:[#allocation3 + $0x3a4] ss:$16 sps:$4 sm:$0xff]   ;;  %v2817_v59 = vld [vmem:[#allocation3 + $0x3a0] ss:$16 sps:$4 sm:$0xff]  }
  0x32   :  { %v2818_v60 = vld [vmem:[#allocation3 + $0x1c4] ss:$16 sps:$4 sm:$0xff]   ;;  %v2822_v62 = vld [vmem:[#allocation3 + $0x1c0] ss:$16 sps:$4 sm:$0xff]  }
  0x33   :  { %1468 = vmatpush1.bf16.msra.mxu1 %v2780_v31  ;;  %v2820_v61 = vld [vmem:[#allocation3 + $0x3c4] ss:$16 sps:$4 sm:$0xff]   ;;  %v2823_v63 = vld [vmem:[#allocation3 + $0x3c0] ss:$16 sps:$4 sm:$0xff]   ;;  %v2877_v31 = vld [vmem:[#allocation3 + $0xcc] ss:$16 sps:$4 sm:$0xff]  }
  0x34   :  { %1511 = vmatpush1.bf16.msra.mxu0 %v2781_v32  ;;  %1469 = vmatprep.subr.bf16.mxu1 %v2782_v33  ;;  %v2824_v0 = vld [vmem:[#allocation3 + $0x1e4] ss:$16 sps:$4 sm:$0xff]   ;;  %v2828_v2 = vld [vmem:[#allocation3 + $0x1e0] ss:$16 sps:$4 sm:$0xff]   ;;  %v2875_v33 = vld [vmem:[#allocation3 + $0xc8] ss:$16 sps:$4 sm:$0xff]  }
  0x35   :  { %1512 = vmatprep.subr.bf16.mxu0 %v2784_v34  ;;  %v2826_v1 = vld [vmem:[#allocation3 + $0x3e4] ss:$16 sps:$4 sm:$0xff]   ;;  %v2829_v3 = vld [vmem:[#allocation3 + $0x3e0] ss:$16 sps:$4 sm:$0xff]  }
  0x36   :  { %v2838_v4 = vld [vmem:[#allocation3 + $0x404] ss:$16 sps:$4 sm:$0xff]   ;;  %v3278_v6 = vld [vmem:[%s3538_s0] ss:$28 sps:$4 sm:$0xff]  }
  0x37   :  { %1470 = vmatpush1.bf16.msra.mxu1 %v2786_v35  ;;  %v3283_v7 = vld [vmem:[%s3538_s0 + $0x8] ss:$28 sps:$4 sm:$0xff]   ;;  %v2883_v35 = vld [vmem:[#allocation3 + $0xec] ss:$16 sps:$4 sm:$0xff]  }
  0x38   :  { %1513 = vmatpush1.bf16.msra.mxu0 %v2787_v36  ;;  %1471 = vmatprep.subr.bf16.mxu1 %v2788_v37  ;;  %v2836_v8 = vld [vmem:[#allocation3 + $0x400] ss:$16 sps:$4 sm:$0xff]   ;;  %v2844_v10 = vld [vmem:[#allocation3 + $0x424] ss:$16 sps:$4 sm:$0xff]  }
  0x39   :  { %1514 = vmatprep.subr.bf16.mxu0 %v2790_v38  ;;  %v2842_v12 = vld [vmem:[#allocation3 + $0x420] ss:$16 sps:$4 sm:$0xff]   ;;  %v2850_v14 = vld [vmem:[#allocation3 + $0x444] ss:$16 sps:$4 sm:$0xff]   ;;  %v2881_v38 = vld [vmem:[#allocation3 + $0xe8] ss:$16 sps:$4 sm:$0xff]  }
  0x3a   :  { %v2848_v16 = vld [vmem:[#allocation3 + $0x440] ss:$16 sps:$4 sm:$0xff]   ;;  %v2856_v18 = vld [vmem:[#allocation3 + $0x464] ss:$16 sps:$4 sm:$0xff]  }
  0x3b   :  { %1472 = vmatpush1.bf16.msra.mxu1 %v2792_v40  ;;  %v2854_v20 = vld [vmem:[#allocation3 + $0x460] ss:$16 sps:$4 sm:$0xff]   ;;  %v2862_v22 = vld [vmem:[#allocation3 + $0x484] ss:$16 sps:$4 sm:$0xff]  }
  0x3c   :  { %1515 = vmatpush1.bf16.msra.mxu0 %v2793_v41  ;;  %1473 = vmatprep.subr.bf16.mxu1 %v2794_v42  ;;  %v2860_v24 = vld [vmem:[#allocation3 + $0x480] ss:$16 sps:$4 sm:$0xff]   ;;  %v2868_v26 = vld [vmem:[#allocation3 + $0x4a4] ss:$16 sps:$4 sm:$0xff]   ;;  %v2889_v41 = vld [vmem:[#allocation3 + $0x10c] ss:$16 sps:$4 sm:$0xff]  }
  0x3d   :  { %1516 = vmatprep.subr.bf16.mxu0 %v2796_v43  ;;  %v2866_v28 = vld [vmem:[#allocation3 + $0x4a0] ss:$16 sps:$4 sm:$0xff]   ;;  %v2874_v30 = vld [vmem:[#allocation3 + $0x4c4] ss:$16 sps:$4 sm:$0xff]   ;;  %v2887_v43 = vld [vmem:[#allocation3 + $0x108] ss:$16 sps:$4 sm:$0xff]  }
  0x3e   :  { %v2872_v32 = vld [vmem:[#allocation3 + $0x4c0] ss:$16 sps:$4 sm:$0xff]   ;;  %v2880_v34 = vld [vmem:[#allocation3 + $0x4e4] ss:$16 sps:$4 sm:$0xff]  }
  0x3f   :  { %1474 = vmatpush1.bf16.msra.mxu1 %v2798_v44  ;;  %v3290_v36 = vld [vmem:[%s3538_s0 + $0x14] ss:$28 sps:$4 sm:$0xff]  }
  0x40   :  { %1517 = vmatpush1.bf16.msra.mxu0 %v2799_v45  ;;  %1475 = vmatprep.subr.bf16.mxu1 %v2800_v46  ;;  %v2878_v37 = vld [vmem:[#allocation3 + $0x4e0] ss:$16 sps:$4 sm:$0xff]   ;;  %v2886_v40 = vld [vmem:[#allocation3 + $0x504] ss:$16 sps:$4 sm:$0xff]   ;;  %v2895_v45 = vld [vmem:[#allocation3 + $0x12c] ss:$16 sps:$4 sm:$0xff]  }
  0x41   :  { %1518 = vmatprep.subr.bf16.mxu0 %v2802_v47  ;;  %v2884_v42 = vld [vmem:[#allocation3 + $0x500] ss:$16 sps:$4 sm:$0xff]   ;;  %v2892_v44 = vld [vmem:[#allocation3 + $0x524] ss:$16 sps:$4 sm:$0xff]   ;;  %v2893_v47 = vld [vmem:[#allocation3 + $0x128] ss:$16 sps:$4 sm:$0xff]  }
  0x42   :  { %v2890_v46 = vld [vmem:[#allocation3 + $0x520] ss:$16 sps:$4 sm:$0xff]  }
  0x43   :  { %1476 = vmatpush1.bf16.msra.mxu1 %v2804_v48  ;;  %v2898_v48 = vld [vmem:[#allocation3 + $0x544] ss:$16 sps:$4 sm:$0xff]  }
  0x44   :  { %1519 = vmatpush1.bf16.msra.mxu0 %v2805_v49  ;;  %1477 = vmatprep.subr.bf16.mxu1 %v2806_v50  ;;  %v2901_v49 = vld [vmem:[#allocation3 + $0x14c] ss:$16 sps:$4 sm:$0xff]   ;;  %v2896_v50 = vld [vmem:[#allocation3 + $0x540] ss:$16 sps:$4 sm:$0xff]  }
  0x45   :  { %1520 = vmatprep.subr.bf16.mxu0 %v2808_v52  ;;  %v2904_v52 = vld [vmem:[#allocation3 + $0x564] ss:$16 sps:$4 sm:$0xff]  }
  0x47   :  { %1478 = vmatpush1.bf16.msra.mxu1 %v2810_v54  ;;  %v2907_v54 = vld [vmem:[#allocation3 + $0x16c] ss:$16 sps:$4 sm:$0xff]  }
  0x48   :  { %1521 = vmatpush1.bf16.msra.mxu0 %v2811_v55  ;;  %1479 = vmatprep.subr.bf16.mxu1 %v2812_v56  ;;  %v2902_v55 = vld [vmem:[#allocation3 + $0x560] ss:$16 sps:$4 sm:$0xff]   ;;  %v2905_v56 = vld [vmem:[#allocation3 + $0x168] ss:$16 sps:$4 sm:$0xff]  }
  0x49   :  { %1522 = vmatprep.subr.bf16.mxu0 %v2814_v57  ;;  %v2910_v57 = vld [vmem:[#allocation3 + $0x584] ss:$16 sps:$4 sm:$0xff]  }
  0x4b   :  { %1480 = vmatpush1.bf16.msra.mxu1 %v2816_v58  ;;  %v2913_v58 = vld [vmem:[#allocation3 + $0x18c] ss:$16 sps:$4 sm:$0xff]  }
  0x4c   :  { %1523 = vmatpush1.bf16.msra.mxu0 %v2817_v59  ;;  %1481 = vmatprep.subr.bf16.mxu1 %v2818_v60  ;;  %v2908_v59 = vld [vmem:[#allocation3 + $0x580] ss:$16 sps:$4 sm:$0xff]   ;;  %v2911_v60 = vld [vmem:[#allocation3 + $0x188] ss:$16 sps:$4 sm:$0xff]  }
  0x4d   :  { %1524 = vmatprep.subr.bf16.mxu0 %v2820_v61  ;;  %v2916_v61 = vld [vmem:[#allocation3 + $0x5a4] ss:$16 sps:$4 sm:$0xff]  }
  0x4f   :  { %1482 = vmatpush1.bf16.msra.mxu1 %v2822_v62  ;;  %v2919_v62 = vld [vmem:[#allocation3 + $0x1ac] ss:$16 sps:$4 sm:$0xff]  }
  0x50   :  { %1525 = vmatpush1.bf16.msra.mxu0 %v2823_v63  ;;  %1483 = vmatprep.subr.bf16.mxu1 %v2824_v0  ;;  %v2914_v63 = vld [vmem:[#allocation3 + $0x5a0] ss:$16 sps:$4 sm:$0xff]   ;;  %v2917_v0 = vld [vmem:[#allocation3 + $0x1a8] ss:$16 sps:$4 sm:$0xff]  }
  0x51   :  { %1526 = vmatprep.subr.bf16.mxu0 %v2826_v1  ;;  %v2922_v1 = vld [vmem:[#allocation3 + $0x5c4] ss:$16 sps:$4 sm:$0xff]  }
  0x53   :  { %1484 = vmatpush1.bf16.msra.mxu1 %v2828_v2  ;;  %v2925_v2 = vld [vmem:[#allocation3 + $0x1cc] ss:$16 sps:$4 sm:$0xff]  }
  0x54   :  { %1527 = vmatpush1.bf16.msra.mxu0 %v2829_v3  ;;  %1625 = vmatprep.subr.bf16.mxu1 %v2841_v5  ;;  %v2920_v3 = vld [vmem:[#allocation3 + $0x5c0] ss:$16 sps:$4 sm:$0xff]   ;;  %v2928_v5 = vld [vmem:[#allocation3 + $0x5e4] ss:$16 sps:$4 sm:$0xff]  }
  0x55   :  { %1539 = vmatprep.subr.bf16.mxu0 %v2838_v4  ;;  %v2923_v4 = vld [vmem:[#allocation3 + $0x1c8] ss:$16 sps:$4 sm:$0xff]  }
  0x56   :  { %1486 = vmatmul.mubr.bf16.vlgmr.msra.gmra.mrb[0].mxu1 %v3278_v6 }
  0x57   :  { %1529 = vmatmul.mubr.bf16.vlgmr.msra.gmra.mrb[0].mxu0 %v3283_v7  ;;  %1626 = vmatpush1.bf16.msra.mxu1 %v2839_v9  ;;  %v2926_v9 = vld [vmem:[#allocation3 + $0x5e0] ss:$16 sps:$4 sm:$0xff]  }
  0x58   :  { %1540 = vmatpush1.bf16.msra.mxu0 %v2836_v8  ;;  %1627 = vmatprep.subr.bf16.mxu1 %v2847_v11  ;;  %v2931_v8 = vld [vmem:[#allocation3 + $0x1ec] ss:$16 sps:$4 sm:$0xff]   ;;  %v2937_v11 = vld [vmem:[#allocation3 + $0x604] ss:$16 sps:$4 sm:$0xff]  }
  0x59   :  { %1541 = vmatprep.subr.bf16.mxu0 %v2844_v10  ;;  %1657 = vmatprep.mubr.bf16.mxu1 %v2832_v51  ;;  %v2899_v51 = vld [vmem:[#allocation3 + $0x148] ss:$16 sps:$4 sm:$0xff]  }
  0x5a   :  { %1571 = vmatprep.mubr.bf16.mxu0 %v3290_v36  ;;  %v2929_v10 = vld [vmem:[#allocation3 + $0x1e8] ss:$16 sps:$4 sm:$0xff]  }
  0x5b   :  { %1628 = vmatpush1.bf16.msra.mxu1 %v2845_v13  ;;  %v3296_v13 = vld [vmem:[%s3538_s0 + $0x10] ss:$28 sps:$4 sm:$0xff]  }
  0x5c   :  { %1542 = vmatpush1.bf16.msra.mxu0 %v2842_v12  ;;  %1629 = vmatprep.subr.bf16.mxu1 %v2853_v15  ;;  %v2940_v12 = vld [vmem:[#allocation3 + $0x20c] ss:$16 sps:$4 sm:$0xff]   ;;  %v2938_v15 = vld [vmem:[#allocation3 + $0x208] ss:$16 sps:$4 sm:$0xff]  }
  0x5d   :  { %1543 = vmatprep.subr.bf16.mxu0 %v2850_v14  ;;  %v2935_v14 = vld [vmem:[#allocation3 + $0x600] ss:$16 sps:$4 sm:$0xff]  }
  0x5f   :  { %1630 = vmatpush1.bf16.msra.mxu1 %v2851_v17  ;;  %v2946_v17 = vld [vmem:[#allocation3 + $0x22c] ss:$16 sps:$4 sm:$0xff]  }
  0x60   :  { %1544 = vmatpush1.bf16.msra.mxu0 %v2848_v16  ;;  %1631 = vmatprep.subr.bf16.mxu1 %v2859_v19  ;;  %v2943_v16 = vld [vmem:[#allocation3 + $0x624] ss:$16 sps:$4 sm:$0xff]   ;;  %v2944_v19 = vld [vmem:[#allocation3 + $0x228] ss:$16 sps:$4 sm:$0xff]  }
  0x61   :  { %1545 = vmatprep.subr.bf16.mxu0 %v2856_v18  ;;  %v2941_v18 = vld [vmem:[#allocation3 + $0x620] ss:$16 sps:$4 sm:$0xff]  }
  0x63   :  { %1632 = vmatpush1.bf16.msra.mxu1 %v2857_v21  ;;  %v2952_v21 = vld [vmem:[#allocation3 + $0x24c] ss:$16 sps:$4 sm:$0xff]  }
  0x64   :  { %1546 = vmatpush1.bf16.msra.mxu0 %v2854_v20  ;;  %1633 = vmatprep.subr.bf16.mxu1 %v2865_v23  ;;  %v2949_v20 = vld [vmem:[#allocation3 + $0x644] ss:$16 sps:$4 sm:$0xff]   ;;  %v2950_v23 = vld [vmem:[#allocation3 + $0x248] ss:$16 sps:$4 sm:$0xff]  }
  0x65   :  { %1547 = vmatprep.subr.bf16.mxu0 %v2862_v22  ;;  %v2947_v22 = vld [vmem:[#allocation3 + $0x640] ss:$16 sps:$4 sm:$0xff]  }
  0x67   :  { %1634 = vmatpush1.bf16.msra.mxu1 %v2863_v25  ;;  %v2953_v25 = vld [vmem:[#allocation3 + $0x660] ss:$16 sps:$4 sm:$0xff]  }
  0x68   :  { %1548 = vmatpush1.bf16.msra.mxu0 %v2860_v24  ;;  %1635 = vmatprep.subr.bf16.mxu1 %v2871_v27  ;;  %v2955_v24 = vld [vmem:[#allocation3 + $0x664] ss:$16 sps:$4 sm:$0xff]  }
  0x69   :  { %1549 = vmatprep.subr.bf16.mxu0 %v2868_v26  ;;  %v2956_v26 = vld [vmem:[#allocation3 + $0x268] ss:$16 sps:$4 sm:$0xff]   ;;  %v2961_v27 = vld [vmem:[#allocation3 + $0x684] ss:$16 sps:$4 sm:$0xff]  }
  0x6b   :  { %1636 = vmatpush1.bf16.msra.mxu1 %v2869_v29  ;;  %v2959_v29 = vld [vmem:[#allocation3 + $0x680] ss:$16 sps:$4 sm:$0xff]  }
  0x6c   :  { %1550 = vmatpush1.bf16.msra.mxu0 %v2866_v28  ;;  %1637 = vmatprep.subr.bf16.mxu1 %v2877_v31  ;;  %v2964_v28 = vld [vmem:[#allocation3 + $0x28c] ss:$16 sps:$4 sm:$0xff]  }
  0x6d   :  { %1551 = vmatprep.subr.bf16.mxu0 %v2874_v30  ;;  %v2967_v30 = vld [vmem:[#allocation3 + $0x6a4] ss:$16 sps:$4 sm:$0xff]   ;;  %v2970_v31 = vld [vmem:[#allocation3 + $0x2ac] ss:$16 sps:$4 sm:$0xff]  }
  0x6f   :  { %1638 = vmatpush1.bf16.msra.mxu1 %v2875_v33  ;;  %v2968_v33 = vld [vmem:[#allocation3 + $0x2a8] ss:$16 sps:$4 sm:$0xff]  }
  0x70   :  { %1552 = vmatpush1.bf16.msra.mxu0 %v2872_v32  ;;  %1639 = vmatprep.subr.bf16.mxu1 %v2883_v35  ;;  %v2965_v32 = vld [vmem:[#allocation3 + $0x6a0] ss:$16 sps:$4 sm:$0xff]   ;;  %v2976_v35 = vld [vmem:[#allocation3 + $0x2cc] ss:$16 sps:$4 sm:$0xff]  }
  0x71   :  { %1553 = vmatprep.subr.bf16.mxu0 %v2880_v34  ;;  %v2973_v34 = vld [vmem:[#allocation3 + $0x6c4] ss:$16 sps:$4 sm:$0xff]  }
  0x73   :  { %1640 = vmatpush1.bf16.msra.mxu1 %v2881_v38  ;;  %v2974_v38 = vld [vmem:[#allocation3 + $0x2c8] ss:$16 sps:$4 sm:$0xff]  }
  0x74   :  { %1554 = vmatpush1.bf16.msra.mxu0 %v2878_v37  ;;  %1641 = vmatprep.subr.bf16.mxu1 %v2889_v41  ;;  %v2971_v37 = vld [vmem:[#allocation3 + $0x6c0] ss:$16 sps:$4 sm:$0xff]   ;;  %v2982_v41 = vld [vmem:[#allocation3 + $0x2ec] ss:$16 sps:$4 sm:$0xff]  }
  0x75   :  { %1555 = vmatprep.subr.bf16.mxu0 %v2886_v40  ;;  %v2979_v40 = vld [vmem:[#allocation3 + $0x6e4] ss:$16 sps:$4 sm:$0xff]  }
  0x77   :  { %1642 = vmatpush1.bf16.msra.mxu1 %v2887_v43  ;;  %v2980_v43 = vld [vmem:[#allocation3 + $0x2e8] ss:$16 sps:$4 sm:$0xff]  }
  0x78   :  { %1556 = vmatpush1.bf16.msra.mxu0 %v2884_v42  ;;  %1643 = vmatprep.subr.bf16.mxu1 %v2895_v45  ;;  %v2977_v42 = vld [vmem:[#allocation3 + $0x6e0] ss:$16 sps:$4 sm:$0xff]  }
  0x79   :  { %1557 = vmatprep.subr.bf16.mxu0 %v2892_v44  ;;  %v2986_v44 = vld [vmem:[#allocation3 + $0x30c] ss:$16 sps:$4 sm:$0xff]   ;;  %v3305_v45 = vld [vmem:[%s3538_s0 + $0x18] ss:$28 sps:$4 sm:$0xff]  }
  0x7b   :  { %1644 = vmatpush1.bf16.msra.mxu1 %v2893_v47  ;;  %v2989_v47 = vld [vmem:[#allocation3 + $0x32c] ss:$16 sps:$4 sm:$0xff]  }
  0x7c   :  { %1558 = vmatpush1.bf16.msra.mxu0 %v2890_v46  ;;  %1645 = vmatprep.subr.bf16.mxu1 %v2901_v49  ;;  %v2984_v46 = vld [vmem:[#allocation3 + $0x308] ss:$16 sps:$4 sm:$0xff]  }
  0x7d   :  { %1559 = vmatprep.subr.bf16.mxu0 %v2898_v48  ;;  %v3080_v48 = vld [vmem:[%s3541_s3] ss:$8 sps:$4 sm:$0xff]   ;;  %v3082_v49 = vld [vmem:[%s3541_s3 + $0x4] ss:$8 sps:$4 sm:$0xff]  }
  0x7f   :  { %1646 = vmatpush1.bf16.msra.mxu1 %v2899_v51  ;;  %v3085_v51 = vld [vmem:[%s3541_s3 + $0x14] ss:$8 sps:$4 sm:$0xff]  }
  0x80   :  { %1560 = vmatpush1.bf16.msra.mxu0 %v2896_v50  ;;  %1647 = vmatprep.subr.bf16.mxu1 %v2907_v54  ;;  %v2987_v50 = vld [vmem:[#allocation3 + $0x328] ss:$16 sps:$4 sm:$0xff]  }
  0x81   :  { %1561 = vmatprep.subr.bf16.mxu0 %v2904_v52  ;;  %v2992_v52 = vld [vmem:[#allocation3 + $0x34c] ss:$16 sps:$4 sm:$0xff]  }
  0x82   :  { %v3083_v54 = vld [vmem:[%s3541_s3 + $0x10] ss:$8 sps:$4 sm:$0xff]  }
  0x83   :  { %1648 = vmatpush1.bf16.msra.mxu1 %v2905_v56  ;;  %v2990_v56 = vld [vmem:[#allocation3 + $0x348] ss:$16 sps:$4 sm:$0xff]  }
  0x84   :  { %1562 = vmatpush1.bf16.msra.mxu0 %v2902_v55  ;;  %1649 = vmatprep.subr.bf16.mxu1 %v2913_v58  ;;  %v3088_v55 = vld [vmem:[%s3541_s3 + $0x24] ss:$8 sps:$4 sm:$0xff]  }
  0x85   :  { %1563 = vmatprep.subr.bf16.mxu0 %v2910_v57  ;;  %v2995_v57 = vld [vmem:[#allocation3 + $0x36c] ss:$16 sps:$4 sm:$0xff]   ;;  %v2993_v58 = vld [vmem:[#allocation3 + $0x368] ss:$16 sps:$4 sm:$0xff]  }
  0x87   :  { %1650 = vmatpush1.bf16.msra.mxu1 %v2911_v60  ;;  %v2998_v60 = vld [vmem:[#allocation3 + $0x38c] ss:$16 sps:$4 sm:$0xff]  }
  0x88   :  { %1564 = vmatpush1.bf16.msra.mxu0 %v2908_v59  ;;  %1651 = vmatprep.subr.bf16.mxu1 %v2919_v62  ;;  %v3086_v59 = vld [vmem:[%s3541_s3 + $0x20] ss:$8 sps:$4 sm:$0xff]   ;;  %v3089_v62 = vld [vmem:[%s3541_s3 + $0x30] ss:$8 sps:$4 sm:$0xff]  }
  0x89   :  { %1565 = vmatprep.subr.bf16.mxu0 %v2916_v61  ;;  %v3091_v61 = vld [vmem:[%s3541_s3 + $0x34] ss:$8 sps:$4 sm:$0xff]  }
  0x8b   :  { %1652 = vmatpush1.bf16.msra.mxu1 %v2917_v0  ;;  %v2996_v0 = vld [vmem:[#allocation3 + $0x388] ss:$16 sps:$4 sm:$0xff]  }
  0x8c   :  { %1566 = vmatpush1.bf16.msra.mxu0 %v2914_v63  ;;  %1653 = vmatprep.subr.bf16.mxu1 %v2925_v2  ;;  %v3094_v63 = vld [vmem:[%s3541_s3 + $0x44] ss:$8 sps:$4 sm:$0xff]   ;;  %v3092_v2 = vld [vmem:[%s3541_s3 + $0x40] ss:$8 sps:$4 sm:$0xff]  }
  0x8d   :  { %1567 = vmatprep.subr.bf16.mxu0 %v2922_v1  ;;  %v3001_v1 = vld [vmem:[#allocation3 + $0x3ac] ss:$16 sps:$4 sm:$0xff]  }
  0x8f   :  { %1654 = vmatpush1.bf16.msra.mxu1 %v2923_v4  ;;  %v2999_v4 = vld [vmem:[#allocation3 + $0x3a8] ss:$16 sps:$4 sm:$0xff]  }
  0x90   :  { %1568 = vmatpush1.bf16.msra.mxu0 %v2920_v3  ;;  %1655 = vmatprep.subr.bf16.mxu1 %v2931_v8  ;;  %v3097_v3 = vld [vmem:[%s3541_s3 + $0x54] ss:$8 sps:$4 sm:$0xff]   ;;  %v3095_v8 = vld [vmem:[%s3541_s3 + $0x50] ss:$8 sps:$4 sm:$0xff]  }
  0x91   :  { %1569 = vmatprep.subr.bf16.mxu0 %v2928_v5  ;;  %v3004_v5 = vld [vmem:[#allocation3 + $0x3cc] ss:$16 sps:$4 sm:$0xff]  }
  0x93   :  { %1656 = vmatpush1.bf16.msra.mxu1 %v2929_v10  ;;  %v3002_v10 = vld [vmem:[#allocation3 + $0x3c8] ss:$16 sps:$4 sm:$0xff]  }
  0x94   :  { %1570 = vmatpush1.bf16.msra.mxu0 %v2926_v9  ;;  %1668 = vmatprep.subr.bf16.mxu1 %v2940_v12  ;;  %v3100_v9 = vld [vmem:[%s3541_s3 + $0x64] ss:$8 sps:$4 sm:$0xff]   ;;  %v3098_v12 = vld [vmem:[%s3541_s3 + $0x60] ss:$8 sps:$4 sm:$0xff]  }
  0x95   :  { %1582 = vmatprep.subr.bf16.mxu0 %v2937_v11  ;;  %v3007_v11 = vld [vmem:[#allocation3 + $0x3ec] ss:$16 sps:$4 sm:$0xff]  }
  0x96   :  { %1658 = vmatmul.mubr.bf16.vlgmr.msra.gmra.mrb[4].mxu1 %v3278_v6  ;;  %v2958_v6 = vld [vmem:[#allocation3 + $0x26c] ss:$16 sps:$4 sm:$0xff]  }
  0x97   :  { %1572 = vmatmul.mubr.bf16.vlgmr.msra.gmra.mrb[0].mxu0 %v3296_v13  ;;  %1669 = vmatpush1.bf16.msra.mxu1 %v2938_v15  ;;  %v3005_v15 = vld [vmem:[#allocation3 + $0x3e8] ss:$16 sps:$4 sm:$0xff]  }
  0x98   :  { %1583 = vmatpush1.bf16.msra.mxu0 %v2935_v14  ;;  %1670 = vmatprep.subr.bf16.mxu1 %v2946_v17  ;;  %v3103_v14 = vld [vmem:[%s3541_s3 + $0x74] ss:$8 sps:$4 sm:$0xff]   ;;  %v3101_v17 = vld [vmem:[%s3541_s3 + $0x70] ss:$8 sps:$4 sm:$0xff]  }
  0x99   :  { %1584 = vmatprep.subr.bf16.mxu0 %v2943_v16  ;;  %1614 = vmatprep.mubr.bf16.mxu0 %v3209_v39  ;;  %v3010_v16 = vld [vmem:[#allocation3 + $0x40c] ss:$16 sps:$4 sm:$0xff]  }
  0x9a   :  { %1700 = vmatprep.mubr.bf16.mxu1 %v3272_v53  ;;  %v2962_v53 = vld [vmem:[#allocation3 + $0x288] ss:$16 sps:$4 sm:$0xff]  }
  0x9b   :  { %1671 = vmatpush1.bf16.msra.mxu1 %v2944_v19  ;;  %v3008_v19 = vld [vmem:[#allocation3 + $0x408] ss:$16 sps:$4 sm:$0xff]  }
  0x9c   :  { %1585 = vmatpush1.bf16.msra.mxu0 %v2941_v18  ;;  %1672 = vmatprep.subr.bf16.mxu1 %v2952_v21  ;;  %v3106_v18 = vld [vmem:[%s3541_s3 + $0x84] ss:$8 sps:$4 sm:$0xff]   ;;  %v3104_v21 = vld [vmem:[%s3541_s3 + $0x80] ss:$8 sps:$4 sm:$0xff]  }
  0x9d   :  { %1586 = vmatprep.subr.bf16.mxu0 %v2949_v20  ;;  %v3013_v20 = vld [vmem:[#allocation3 + $0x42c] ss:$16 sps:$4 sm:$0xff]  }
  0x9f   :  { %1673 = vmatpush1.bf16.msra.mxu1 %v2950_v23  ;;  %v3011_v23 = vld [vmem:[#allocation3 + $0x428] ss:$16 sps:$4 sm:$0xff]  }
  0xa0   :  { %1587 = vmatpush1.bf16.msra.mxu0 %v2947_v22  ;;  %1674 = vmatprep.subr.bf16.mxu1 %v2958_v6  ;;  %v3109_v22 = vld [vmem:[%s3541_s3 + $0x94] ss:$8 sps:$4 sm:$0xff]   ;;  %v3107_v6 = vld [vmem:[%s3541_s3 + $0x90] ss:$8 sps:$4 sm:$0xff]  }
  0xa1   :  { %1588 = vmatprep.subr.bf16.mxu0 %v2955_v24  ;;  %v3016_v24 = vld [vmem:[#allocation3 + $0x44c] ss:$16 sps:$4 sm:$0xff]  }
  0xa3   :  { %1675 = vmatpush1.bf16.msra.mxu1 %v2956_v26  ;;  %v3019_v26 = vld [vmem:[#allocation3 + $0x46c] ss:$16 sps:$4 sm:$0xff]  }
  0xa4   :  { %1589 = vmatpush1.bf16.msra.mxu0 %v2953_v25  ;;  %1676 = vmatprep.subr.bf16.mxu1 %v2964_v28  ;;  %v3014_v25 = vld [vmem:[#allocation3 + $0x448] ss:$16 sps:$4 sm:$0xff]  }
  0xa5   :  { %1590 = vmatprep.subr.bf16.mxu0 %v2961_v27  ;;  %v3115_v27 = vld [vmem:[%s3541_s3 + $0xb4] ss:$8 sps:$4 sm:$0xff]  }
  0xa6   :  { %v3017_v28 = vld [vmem:[#allocation3 + $0x468] ss:$16 sps:$4 sm:$0xff]  }
  0xa7   :  { %1677 = vmatpush1.bf16.msra.mxu1 %v2962_v53  ;;  %v3113_v53 = vld [vmem:[%s3541_s3 + $0xb0] ss:$8 sps:$4 sm:$0xff]  }
  0xa8   :  { %1591 = vmatpush1.bf16.msra.mxu0 %v2959_v29  ;;  %1678 = vmatprep.subr.bf16.mxu1 %v2970_v31  ;;  %v3022_v29 = vld [vmem:[#allocation3 + $0x48c] ss:$16 sps:$4 sm:$0xff]   ;;  %v3020_v31 = vld [vmem:[#allocation3 + $0x488] ss:$16 sps:$4 sm:$0xff]  }
  0xa9   :  { %1592 = vmatprep.subr.bf16.mxu0 %v2967_v30  ;;  %v3118_v30 = vld [vmem:[%s3541_s3 + $0xc4] ss:$8 sps:$4 sm:$0xff]  }
  0xab   :  { %1679 = vmatpush1.bf16.msra.mxu1 %v2968_v33  ;;  %v3116_v33 = vld [vmem:[%s3541_s3 + $0xc0] ss:$8 sps:$4 sm:$0xff]  }
  0xac   :  { %1593 = vmatpush1.bf16.msra.mxu0 %v2965_v32  ;;  %1680 = vmatprep.subr.bf16.mxu1 %v2976_v35  ;;  %v3025_v32 = vld [vmem:[#allocation3 + $0x4ac] ss:$16 sps:$4 sm:$0xff]  }
  0xad   :  { %1594 = vmatprep.subr.bf16.mxu0 %v2973_v34  ;;  %v3023_v34 = vld [vmem:[#allocation3 + $0x4a8] ss:$16 sps:$4 sm:$0xff]   ;;  %v3028_v35 = vld [vmem:[#allocation3 + $0x4cc] ss:$16 sps:$4 sm:$0xff]  }
  0xaf   :  { %1681 = vmatpush1.bf16.msra.mxu1 %v2974_v38  ;;  %v3031_v38 = vld [vmem:[#allocation3 + $0x4ec] ss:$16 sps:$4 sm:$0xff]  }
  0xb0   :  { %1595 = vmatpush1.bf16.msra.mxu0 %v2971_v37  ;;  %1682 = vmatprep.subr.bf16.mxu1 %v2982_v41  ;;  %v3026_v37 = vld [vmem:[#allocation3 + $0x4c8] ss:$16 sps:$4 sm:$0xff]   ;;  %v3034_v41 = vld [vmem:[#allocation3 + $0x50c] ss:$16 sps:$4 sm:$0xff]  }
  0xb1   :  { %1596 = vmatprep.subr.bf16.mxu0 %v2979_v40  ;;  %v3029_v40 = vld [vmem:[#allocation3 + $0x4e8] ss:$16 sps:$4 sm:$0xff]  }
  0xb3   :  { %1683 = vmatpush1.bf16.msra.mxu1 %v2980_v43  ;;  %v3037_v43 = vld [vmem:[#allocation3 + $0x52c] ss:$16 sps:$4 sm:$0xff]  }
  0xb4   :  { %1597 = vmatpush1.bf16.msra.mxu0 %v2977_v42  ;;  %1684 = vmatprep.subr.bf16.mxu1 %v2986_v44  ;;  %v3032_v42 = vld [vmem:[#allocation3 + $0x508] ss:$16 sps:$4 sm:$0xff]  }
  0xb5   :  { %2221 = vmatprep.subr.bf16.mxu0 %v3082_v49  ;;  %v3035_v44 = vld [vmem:[#allocation3 + $0x528] ss:$16 sps:$4 sm:$0xff]  }
  0xb6   :  { %v3041_v49 = vld [vmem:[#allocation3 + $0x568] ss:$16 sps:$4 sm:$0xff]  }
  0xb7   :  { %1615 = vmatmul.mubr.bf16.vlgmr.msra.gmra.mrb[0].mxu0 %v3305_v45  ;;  %1685 = vmatpush1.bf16.msra.mxu1 %v2984_v46  ;;  %v3040_v46 = vld [vmem:[#allocation3 + $0x54c] ss:$16 sps:$4 sm:$0xff]  }
  0xb8   :  { %1686 = vmatprep.subr.bf16.mxu1 %v2989_v47  ;;  %2222 = vmatpush1.bf16.msra.mxu0 %v3080_v48  ;;  %v3038_v47 = vld [vmem:[#allocation3 + $0x548] ss:$16 sps:$4 sm:$0xff]   ;;  %v3043_v48 = vld [vmem:[#allocation3 + $0x56c] ss:$16 sps:$4 sm:$0xff]  }
  0xb9   :  { %2223 = vmatprep.subr.bf16.mxu0 %v3085_v51  ;;  %v3044_v51 = vld [vmem:[#allocation3 + $0x588] ss:$16 sps:$4 sm:$0xff]  }
  0xbb   :  { %1687 = vmatpush1.bf16.msra.mxu1 %v2987_v50  ;;  %v3046_v50 = vld [vmem:[#allocation3 + $0x58c] ss:$16 sps:$4 sm:$0xff]  }
  0xbc   :  { %1688 = vmatprep.subr.bf16.mxu1 %v2992_v52  ;;  %2224 = vmatpush1.bf16.msra.mxu0 %v3083_v54  ;;  %v3049_v52 = vld [vmem:[#allocation3 + $0x5ac] ss:$16 sps:$4 sm:$0xff]   ;;  %v3047_v54 = vld [vmem:[#allocation3 + $0x5a8] ss:$16 sps:$4 sm:$0xff]  }
  0xbd   :  { %2225 = vmatprep.subr.bf16.mxu0 %v3088_v55  ;;  %v3121_v55 = vld [vmem:[%s3541_s3 + $0xd4] ss:$8 sps:$4 sm:$0xff]  }
  0xbf   :  { %1689 = vmatpush1.bf16.msra.mxu1 %v2990_v56  ;;  %v3052_v56 = vld [vmem:[#allocation3 + $0x5cc] ss:$16 sps:$4 sm:$0xff]  }
  0xc0   :  { %1690 = vmatprep.subr.bf16.mxu1 %v2995_v57  ;;  %2226 = vmatpush1.bf16.msra.mxu0 %v3086_v59  ;;  %v3119_v57 = vld [vmem:[%s3541_s3 + $0xd0] ss:$8 sps:$4 sm:$0xff]   ;;  %v3124_v59 = vld [vmem:[%s3541_s3 + $0xe4] ss:$8 sps:$4 sm:$0xff]  }
  0xc1   :  { %2227 = vmatprep.subr.bf16.mxu0 %v3091_v61  ;;  %v3122_v61 = vld [vmem:[%s3541_s3 + $0xe0] ss:$8 sps:$4 sm:$0xff]  }
  0xc3   :  { %1691 = vmatpush1.bf16.msra.mxu1 %v2993_v58  ;;  %v3050_v58 = vld [vmem:[#allocation3 + $0x5c8] ss:$16 sps:$4 sm:$0xff]  }
  0xc4   :  { %1692 = vmatprep.subr.bf16.mxu1 %v2998_v60  ;;  %2228 = vmatpush1.bf16.msra.mxu0 %v3089_v62  ;;  %v3055_v60 = vld [vmem:[#allocation3 + $0x5ec] ss:$16 sps:$4 sm:$0xff]   ;;  %v3053_v62 = vld [vmem:[#allocation3 + $0x5e8] ss:$16 sps:$4 sm:$0xff]  }
  0xc5   :  { %2229 = vmatprep.subr.bf16.mxu0 %v3094_v63  ;;  %v3127_v63 = vld [vmem:[%s3541_s3 + $0xf4] ss:$8 sps:$4 sm:$0xff]  }
  0xc7   :  { %1693 = vmatpush1.bf16.msra.mxu1 %v2996_v0  ;;  %v3058_v0 = vld [vmem:[#allocation3 + $0x60c] ss:$16 sps:$4 sm:$0xff]  }
  0xc8   :  { %1694 = vmatprep.subr.bf16.mxu1 %v3001_v1  ;;  %2230 = vmatpush1.bf16.msra.mxu0 %v3092_v2  ;;  %v3125_v1 = vld [vmem:[%s3541_s3 + $0xf0] ss:$8 sps:$4 sm:$0xff]  }
  0xc9   :  { %2231 = vmatprep.subr.bf16.mxu0 %v3097_v3  ;;  %v3056_v2 = vld [vmem:[#allocation3 + $0x608] ss:$16 sps:$4 sm:$0xff]   ;;  %v3061_v3 = vld [vmem:[#allocation3 + $0x62c] ss:$16 sps:$4 sm:$0xff]  }
  0xcb   :  { %1695 = vmatpush1.bf16.msra.mxu1 %v2999_v4  ;;  %v3130_v4 = vld [vmem:[%s3541_s3 + $0x104] ss:$8 sps:$4 sm:$0xff]  }
  0xcc   :  { %1696 = vmatprep.subr.bf16.mxu1 %v3004_v5  ;;  %2232 = vmatpush1.bf16.msra.mxu0 %v3095_v8  ;;  %v3059_v5 = vld [vmem:[#allocation3 + $0x628] ss:$16 sps:$4 sm:$0xff]   ;;  %v3064_v8 = vld [vmem:[#allocation3 + $0x64c] ss:$16 sps:$4 sm:$0xff]  }
  0xcd   :  { %2233 = vmatprep.subr.bf16.mxu0 %v3100_v9  ;;  %v3062_v9 = vld [vmem:[#allocation3 + $0x648] ss:$16 sps:$4 sm:$0xff]  }
  0xcf   :  { %1697 = vmatpush1.bf16.msra.mxu1 %v3002_v10  ;;  %v3067_v10 = vld [vmem:[#allocation3 + $0x66c] ss:$16 sps:$4 sm:$0xff]  }
  0xd0   :  { %1698 = vmatprep.subr.bf16.mxu1 %v3007_v11  ;;  %2234 = vmatpush1.bf16.msra.mxu0 %v3098_v12  ;;  %v3065_v11 = vld [vmem:[#allocation3 + $0x668] ss:$16 sps:$4 sm:$0xff]   ;;  %v3070_v12 = vld [vmem:[#allocation3 + $0x68c] ss:$16 sps:$4 sm:$0xff]  }
  0xd1   :  { %2235 = vmatprep.subr.bf16.mxu0 %v3103_v14  ;;  %v3068_v14 = vld [vmem:[#allocation3 + $0x688] ss:$16 sps:$4 sm:$0xff]  }
  0xd3   :  { %1699 = vmatpush1.bf16.msra.mxu1 %v3005_v15  ;;  %v3073_v15 = vld [vmem:[#allocation3 + $0x6ac] ss:$16 sps:$4 sm:$0xff]  }
  0xd4   :  { %1711 = vmatprep.subr.bf16.mxu1 %v3010_v16  ;;  %2236 = vmatpush1.bf16.msra.mxu0 %v3101_v17  ;;  %v3076_v16 = vld [vmem:[#allocation3 + $0x6cc] ss:$16 sps:$4 sm:$0xff]  }
  0xd5   :  { %2237 = vmatprep.subr.bf16.mxu0 %v3106_v18 }
  0xd6   :  { %1701 = vmatmul.mubr.bf16.vlgmr.msra.gmra.mrb[4].mxu1 %v3283_v7  ;;  %v3112_v7 = vld [vmem:[%s3541_s3 + $0xa4] ss:$8 sps:$4 sm:$0xff]  }
  0xd7   :  { %1712 = vmatpush1.bf16.msra.mxu1 %v3008_v19  ;;  %1743 = vmatprep.mubr.bf16.mxu1 %v3290_v36  ;;  %v3110_v36 = vld [vmem:[%s3541_s3 + $0xa0] ss:$8 sps:$4 sm:$0xff]  }
  0xd8   :  { %1713 = vmatprep.subr.bf16.mxu1 %v3013_v20  ;;  %2238 = vmatpush1.bf16.msra.mxu0 %v3104_v21  ;;  %v3074_v19 = vld [vmem:[#allocation3 + $0x6c8] ss:$16 sps:$4 sm:$0xff]   ;;  %v3079_v21 = vld [vmem:[#allocation3 + $0x6ec] ss:$16 sps:$4 sm:$0xff]  }
  0xd9   :  { %2239 = vmatprep.subr.bf16.mxu0 %v3109_v22  ;;  %v3077_v22 = vld [vmem:[#allocation3 + $0x6e8] ss:$16 sps:$4 sm:$0xff]  }
  0xdb   :  { %1714 = vmatpush1.bf16.msra.mxu1 %v3011_v23  ;;  %v277_v23 = vlaneseq }
  0xdc   :  { %1715 = vmatprep.subr.bf16.mxu1 %v3016_v24  ;;  %2240 = vmatpush1.bf16.msra.mxu0 %v3107_v6 }
  0xdd   :  { %2241 = vmatprep.subr.bf16.mxu0 %v3112_v7  ;;  %v3412_v24 = vshrl.u32 %v277_v23, 7  ;;  %v3420_v7 = vld [vmem:[%s3540_s2] sm:$0xf] }
  0xdf   :  { %1716 = vmatpush1.bf16.msra.mxu1 %v3014_v25  ;;  %v3415_v6 = vsub.s32 0, %v3412_v24  ;;  %v283_v25 = vsub.s32 1, %v3412_v24 }
  0xe0   :  { %1717 = vmatprep.subr.bf16.mxu1 %v3019_v26  ;;  %2242 = vmatpush1.bf16.msra.mxu0 %v3110_v36 }
  0xe1   :  { %2243 = vmatprep.subr.bf16.mxu0 %v3115_v27  ;;  %v280_v26 = vrot.slane %v3420_v7, %v3415_v6 }
  0xe3   :  { %1718 = vmatpush1.bf16.msra.mxu1 %v3017_v28 }
  0xe4   :  { %1719 = vmatprep.subr.bf16.mxu1 %v3022_v29  ;;  %2244 = vmatpush1.bf16.msra.mxu0 %v3113_v53 }
  0xe5   :  { %2245 = vmatprep.subr.bf16.mxu0 %v3118_v30 }
  0xe7   :  { %1720 = vmatpush1.bf16.msra.mxu1 %v3020_v31 }
  0xe8   :  { %1721 = vmatprep.subr.bf16.mxu1 %v3025_v32  ;;  %2246 = vmatpush1.bf16.msra.mxu0 %v3116_v33 }
  0xe9   :  { %2247 = vmatprep.subr.bf16.mxu0 %v3121_v55  ;;  %v3134_v55 = vld [vmem:[%s3541_s3 + $0x120] ss:$8 sps:$4 sm:$0xff]  }
  0xeb   :  { %1722 = vmatpush1.bf16.msra.mxu1 %v3023_v34 }
  0xec   :  { %1723 = vmatprep.subr.bf16.mxu1 %v3028_v35  ;;  %2248 = vmatpush1.bf16.msra.mxu0 %v3119_v57  ;;  %v3137_v57 = vld [vmem:[%s3541_s3 + $0x130] ss:$8 sps:$4 sm:$0xff]  }
  0xed   :  { %2249 = vmatprep.subr.bf16.mxu0 %v3124_v59  ;;  %v3140_v59 = vld [vmem:[%s3541_s3 + $0x140] ss:$8 sps:$4 sm:$0xff]  }
  0xef   :  { %1724 = vmatpush1.bf16.msra.mxu1 %v3026_v37 }
  0xf0   :  { %1725 = vmatprep.subr.bf16.mxu1 %v3031_v38  ;;  %2250 = vmatpush1.bf16.msra.mxu0 %v3122_v61  ;;  %v3143_v61 = vld [vmem:[%s3541_s3 + $0x150] ss:$8 sps:$4 sm:$0xff]  }
  0xf1   :  { %2251 = vmatprep.subr.bf16.mxu0 %v3127_v63  ;;  %v3146_v63 = vld [vmem:[%s3541_s3 + $0x160] ss:$8 sps:$4 sm:$0xff]  }
  0xf3   :  { %1726 = vmatpush1.bf16.msra.mxu1 %v3029_v40 }
  0xf4   :  { %1727 = vmatprep.subr.bf16.mxu1 %v3034_v41  ;;  %2252 = vmatpush1.bf16.msra.mxu0 %v3125_v1  ;;  %v3149_v1 = vld [vmem:[%s3541_s3 + $0x170] ss:$8 sps:$4 sm:$0xff]  }
  0xf5   :  { %2264 = vmatprep.subr.bf16.mxu0 %v3130_v4  ;;  %v3157_v4 = vld [vmem:[%s3541_s3 + $0x194] ss:$8 sps:$4 sm:$0xff]  }
  0xf7   :  { %1728 = vmatpush1.bf16.msra.mxu1 %v3032_v42 }
  0xf8   :  { %1729 = vmatprep.subr.bf16.mxu1 %v3037_v43 }
  0xfb   :  { %1730 = vmatpush1.bf16.msra.mxu1 %v3035_v44 }
  0xfc   :  { %1731 = vmatprep.subr.bf16.mxu1 %v3040_v46 }
  0xff   :  { %1732 = vmatpush1.bf16.msra.mxu1 %v3038_v47 }
 0x100   :  { %1733 = vmatprep.subr.bf16.mxu1 %v3043_v48 }
 0x103   :  { %1734 = vmatpush1.bf16.msra.mxu1 %v3041_v49 }
 0x104   :  { %1735 = vmatprep.subr.bf16.mxu1 %v3046_v50  ;;  %v3128_v50 = vld [vmem:[%s3541_s3 + $0x100] ss:$8 sps:$4 sm:$0xff]  }
 0x107   :  { %1736 = vmatpush1.bf16.msra.mxu1 %v3044_v51  ;;  %v3133_v51 = vld [vmem:[%s3541_s3 + $0x114] ss:$8 sps:$4 sm:$0xff]  }
 0x108   :  { %1737 = vmatprep.subr.bf16.mxu1 %v3049_v52  ;;  %v3131_v52 = vld [vmem:[%s3541_s3 + $0x110] ss:$8 sps:$4 sm:$0xff]  }
 0x10b   :  { %1738 = vmatpush1.bf16.msra.mxu1 %v3047_v54  ;;  %v3136_v54 = vld [vmem:[%s3541_s3 + $0x124] ss:$8 sps:$4 sm:$0xff]  }
 0x10c   :  { %1739 = vmatprep.subr.bf16.mxu1 %v3052_v56  ;;  %v3139_v56 = vld [vmem:[%s3541_s3 + $0x134] ss:$8 sps:$4 sm:$0xff]  }
 0x10f   :  { %1740 = vmatpush1.bf16.msra.mxu1 %v3050_v58  ;;  %v3142_v58 = vld [vmem:[%s3541_s3 + $0x144] ss:$8 sps:$4 sm:$0xff]  }
 0x110   :  { %1741 = vmatprep.subr.bf16.mxu1 %v3055_v60  ;;  %v3145_v60 = vld [vmem:[%s3541_s3 + $0x154] ss:$8 sps:$4 sm:$0xff]  }
 0x113   :  { %1742 = vmatpush1.bf16.msra.mxu1 %v3053_v62  ;;  %v3148_v62 = vld [vmem:[%s3541_s3 + $0x164] ss:$8 sps:$4 sm:$0xff]  }
 0x114   :  { %1754 = vmatprep.subr.bf16.mxu1 %v3058_v0  ;;  %v3151_v0 = vld [vmem:[%s3541_s3 + $0x174] ss:$8 sps:$4 sm:$0xff]  }
 0x116   :  { %1744 = vmatmul.mubr.bf16.vlgmr.msra.gmra.mrb[4].mxu1 %v3296_v13  ;;  %v3071_v13 = vld [vmem:[#allocation3 + $0x6a8] ss:$16 sps:$4 sm:$0xff]  }
 0x117   :  { %1755 = vmatpush1.bf16.msra.mxu1 %v3056_v2  ;;  %1786 = vmatprep.mubr.bf16.mxu1 %v3209_v39  ;;  %v3154_v2 = vld [vmem:[%s3541_s3 + $0x184] ss:$8 sps:$4 sm:$0xff]  }
 0x118   :  { %1756 = vmatprep.subr.bf16.mxu1 %v3061_v3  ;;  %v3152_v3 = vld [vmem:[%s3541_s3 + $0x180] ss:$8 sps:$4 sm:$0xff]  }
 0x11b   :  { %1757 = vmatpush1.bf16.msra.mxu1 %v3059_v5  ;;  %v3155_v5 = vld [vmem:[%s3541_s3 + $0x190] ss:$8 sps:$4 sm:$0xff]  }
 0x11c   :  { %1758 = vmatprep.subr.bf16.mxu1 %v3064_v8  ;;  %v3160_v8 = vld [vmem:[%s3541_s3 + $0x1a4] ss:$8 sps:$4 sm:$0xff]  }
 0x11f   :  { %1759 = vmatpush1.bf16.msra.mxu1 %v3062_v9  ;;  %v3158_v9 = vld [vmem:[%s3541_s3 + $0x1a0] ss:$8 sps:$4 sm:$0xff]  }
 0x120   :  { %1760 = vmatprep.subr.bf16.mxu1 %v3067_v10  ;;  %v3163_v10 = vld [vmem:[%s3541_s3 + $0x1b4] ss:$8 sps:$4 sm:$0xff]  }
 0x123   :  { %1761 = vmatpush1.bf16.msra.mxu1 %v3065_v11  ;;  %v3161_v11 = vld [vmem:[%s3541_s3 + $0x1b0] ss:$8 sps:$4 sm:$0xff]  }
 0x124   :  { %1762 = vmatprep.subr.bf16.mxu1 %v3070_v12  ;;  %v3166_v12 = vld [vmem:[%s3541_s3 + $0x1c4] ss:$8 sps:$4 sm:$0xff]  }
 0x127   :  { %1763 = vmatpush1.bf16.msra.mxu1 %v3068_v14  ;;  %v3164_v14 = vld [vmem:[%s3541_s3 + $0x1c0] ss:$8 sps:$4 sm:$0xff]  }
 0x128   :  { %1764 = vmatprep.subr.bf16.mxu1 %v3073_v15  ;;  %v3169_v15 = vld [vmem:[%s3541_s3 + $0x1d4] ss:$8 sps:$4 sm:$0xff]  }
 0x129   :  { %v1487_v39 = vpop.f32.mrb[0].mxu1 }
 0x12a   :  { %v1489_v17 = vpop.f32.mrb[1].mxu1  ;;  %v1488_v36 = vadd.f32 %v1487_v39, %v280_v26  ;;  %v3170_v39 = vld [vmem:[%s3541_s3 + $0x1e0] ss:$8 sps:$4 sm:$0xff]  }
 0x12b   :  { %v1491_v18 = vpop.f32.mrb[2].mxu1  ;;  %1765 = vmatpush1.bf16.msra.mxu1 %v3071_v13  ;;  %v3167_v13 = vld [vmem:[%s3541_s3 + $0x1d0] ss:$8 sps:$4 sm:$0xff]  }
 0x12c   :  { %v1493_v20 = vpop.f32.mrb[3].mxu1  ;;  %1766 = vmatprep.subr.bf16.mxu1 %v3076_v16  ;;  %v1492_v29 = vadd.f32 %v1491_v18, %v280_v26  ;;  %v3172_v16 = vld [vmem:[%s3541_s3 + $0x1e4] ss:$8 sps:$4 sm:$0xff]   ;;  %v3173_v18 = vld [vmem:[%s3541_s3 + $0x1f0] ss:$8 sps:$4 sm:$0xff]  }
 0x12f   :  { %1767 = vmatpush1.bf16.msra.mxu1 %v3074_v19  ;;  %v287_v19 = vsub.s32 2, %v3412_v24 }
 0x130   :  { %1768 = vmatprep.subr.bf16.mxu1 %v3079_v21 }
 0x131   :  { %v288_v21 = vrot.slane %v3420_v7, %v287_v19 }
 0x133   :  { %1769 = vmatpush1.bf16.msra.mxu1 %v3077_v22 }
 0x136   :  { %1787 = vmatmul.mubr.bf16.vlgmr.msra.gmra.mrb[4].mxu1 %v3305_v45  ;;  %v284_v45 = vrot.slane %v3420_v7, %v283_v25 }
 0x138   :  { %v1490_v27 = vadd.f32 %v1489_v17, %v284_v45  ;;  %v1494_v31 = vadd.f32 %v1493_v20, %v284_v45  ;;  %v3175_v17 = vld [vmem:[%s3541_s3 + $0x1f4] ss:$8 sps:$4 sm:$0xff]   ;;  %v291_v20 = vsub.s32 3, %v3412_v24 }
 0x13a   :  { %v292_v22 = vrot.slane %v3420_v7, %v291_v20 }
 0x18a   :  { %v1616_v28 = vpop.f32.mrb[0].mxu0 }
 0x18b   :  { %v2690_v53 = vadd.f32 %v1616_v28, %v1488_v36  ;;  %v1618_v30 = vpop.f32.mrb[1].mxu0 }
 0x18c   :  { %v2692_v32 = vadd.f32 %v1618_v30, %v1490_v27  ;;  %v1620_v33 = vpop.f32.mrb[2].mxu0 }
 0x18d   :  { %v1805_v34 = vmul.f32 0.2, %v2690_v53  ;;  %v2694_v35 = vadd.f32 %v1620_v33, %v1492_v29  ;;  %v1622_v37 = vpop.f32.mrb[3].mxu0  ;;  %vm1797_vm0 = vcmp.gt.f32.partialorder %v2690_v53, 0.0 }
 0x18e   :  { %v1806_v38 = vmul.f32 0.2, %v2692_v32  ;;  %v2696_v40 = vadd.f32 %v1622_v37, %v1494_v31  ;;  %vm1798_vm1 = vcmp.gt.f32.partialorder %v2692_v32, 0.0 }
 0x18f   :  { %vm1801_vm2 = vcmp.gt.f32.partialorder %v2694_v35, 0.0  ;;  %v1809_v41 = vmul.f32 0.2, %v2694_v35  ;;  %v1813_v43 = vsel %vm1797_vm0, %v2690_v53, %v1805_v34 }
 0x190   :  { %vm1802_vm3 = vcmp.gt.f32.partialorder %v2696_v40, 0.0  ;;  %v1810_v42 = vmul.f32 0.2, %v2696_v40  ;;  %v1814_v47 = vsel %vm1798_vm1, %v2692_v32, %v1806_v38 }
 0x191   :  { %v1817_v44 = vsel %vm1801_vm2, %v2694_v35, %v1809_v41  ;;  %v2319_v41 = vld [vmem:[%s3543_s5] sm:$0xff] }
 0x192   :  { %v1821_v46 = vpack.c.bf16 %v1817_v44, %v1813_v43  ;;  %v1818_v48 = vsel %vm1802_vm3, %v2696_v40, %v1810_v42  ;;  %v2688_v42 = vcombine.high %v2319_v41, %v2319_v41  ;;  %v2369_v43 = vld [vmem:[#allocation2] sm:$0x1] }
 0x193   :  { %v1822_v49 = vpack.c.bf16 %v1818_v48, %v1814_v47  ;;  %2372 = vperm.xlu0 %2733, %v2369_v43   ;;  %v1889_v44 = vld [vmem:[%s3542_s4] sm:$0x3] }
 0x194   :  { %2361 = vmatprep.mubr.bf16.mxu1 %v2688_v42  ;;  %v1898_v47 = vrot.slane %v1889_v44, %v283_v25 }
 0x195   :  { %2253 = vmatprep.mubr.bf16.mxu0 %v1822_v49 }
 0x196   :  { %2254 = vmatmul.mubr.bf16.vlgmr.msra.gmra.mrb[4].mxu0 %v1821_v46  ;;  %v1894_v46 = vrot.slane %v1889_v44, %v3415_v6 }
 0x197   :  { %2265 = vmatpush1.bf16.msra.mxu0 %v3128_v50 }
 0x198   :  { %2266 = vmatprep.subr.bf16.mxu0 %v3133_v51 }
 0x19b   :  { %2267 = vmatpush1.bf16.msra.mxu0 %v3131_v52 }
 0x19c   :  { %2268 = vmatprep.subr.bf16.mxu0 %v3136_v54 }
 0x19f   :  { %2269 = vmatpush1.bf16.msra.mxu0 %v3134_v55 }
 0x1a0   :  { %2270 = vmatprep.subr.bf16.mxu0 %v3139_v56 }
 0x1a3   :  { %2271 = vmatpush1.bf16.msra.mxu0 %v3137_v57 }
 0x1a4   :  { %2272 = vmatprep.subr.bf16.mxu0 %v3142_v58 }
 0x1a7   :  { %2273 = vmatpush1.bf16.msra.mxu0 %v3140_v59 }
 0x1a8   :  { %2274 = vmatprep.subr.bf16.mxu0 %v3145_v60 }
 0x1ab   :  { %2275 = vmatpush1.bf16.msra.mxu0 %v3143_v61 }
 0x1ac   :  { %2276 = vmatprep.subr.bf16.mxu0 %v3148_v62 }
 0x1af   :  { %2277 = vmatpush1.bf16.msra.mxu0 %v3146_v63 }
 0x1b0   :  { %2278 = vmatprep.subr.bf16.mxu0 %v3151_v0 }
 0x1b3   :  { %2279 = vmatpush1.bf16.msra.mxu0 %v3149_v1  ;;  %v2687_v1 = vcombine.low %v2319_v41, %v2319_v41 }
 0x1b4   :  { %2280 = vmatprep.subr.bf16.mxu0 %v3154_v2 }
 0x1b7   :  { %2281 = vmatpush1.bf16.msra.mxu0 %v3152_v3 }
 0x1b8   :  { %2282 = vmatprep.subr.bf16.mxu0 %v3157_v4 }
 0x1bb   :  { %2283 = vmatpush1.bf16.msra.mxu0 %v3155_v5 }
 0x1bc   :  { %2284 = vmatprep.subr.bf16.mxu0 %v3160_v8 }
 0x1bf   :  { %2285 = vmatpush1.bf16.msra.mxu0 %v3158_v9 }
 0x1c0   :  { %2286 = vmatprep.subr.bf16.mxu0 %v3163_v10 }
 0x1c3   :  { %2287 = vmatpush1.bf16.msra.mxu0 %v3161_v11 }
 0x1c4   :  { %2288 = vmatprep.subr.bf16.mxu0 %v3166_v12 }
 0x1c7   :  { %2289 = vmatpush1.bf16.msra.mxu0 %v3164_v14 }
 0x1c8   :  { %2290 = vmatprep.subr.bf16.mxu0 %v3169_v15 }
 0x1cb   :  { %2291 = vmatpush1.bf16.msra.mxu0 %v3167_v13 }
 0x1cc   :  { %2292 = vmatprep.subr.bf16.mxu0 %v3172_v16 }
 0x1cf   :  { %2293 = vmatpush1.bf16.msra.mxu0 %v3170_v39 }
 0x1d0   :  { %2294 = vmatprep.subr.bf16.mxu0 %v3175_v17 }
 0x1d3   :  { %2295 = vmatpush1.bf16.msra.mxu0 %v3173_v18 }
 0x209   :  { %v1788_v23 = vpop.f32.mrb[4].mxu1 }
 0x20a   :  { %v2697_v26 = vadd.f32 %v1788_v23, %v288_v21  ;;  %v1790_v45 = vpop.f32.mrb[5].mxu1 }
 0x20b   :  { %v2698_v36 = vadd.f32 %v1790_v45, %v292_v22  ;;  %v1792_v27 = vpop.f32.mrb[6].mxu1 }
 0x20c   :  { %v1807_v28 = vmul.f32 0.2, %v2697_v26  ;;  %v2699_v29 = vadd.f32 %v1792_v27, %v288_v21  ;;  %v1794_v53 = vpop.f32.mrb[7].mxu1  ;;  %vm1799_vm4 = vcmp.gt.f32.partialorder %v2697_v26, 0.0 }
 0x20d   :  { %v1808_v30 = vmul.f32 0.2, %v2698_v36  ;;  %v2700_v31 = vadd.f32 %v1794_v53, %v292_v22  ;;  %vm1800_vm5 = vcmp.gt.f32.partialorder %v2698_v36, 0.0 }
 0x20e   :  { %vm1803_vm6 = vcmp.gt.f32.partialorder %v2699_v29, 0.0  ;;  %v1811_v32 = vmul.f32 0.2, %v2699_v29  ;;  %v1815_v34 = vsel %vm1799_vm4, %v2697_v26, %v1807_v28 }
 0x20f   :  { %vm1804_vm7 = vcmp.gt.f32.partialorder %v2700_v31, 0.0  ;;  %v1812_v33 = vmul.f32 0.2, %v2700_v31  ;;  %v1816_v7 = vsel %vm1800_vm5, %v2698_v36, %v1808_v30 }
 0x210   :  { %v1819_v35 = vsel %vm1803_vm6, %v2699_v29, %v1811_v32 }
 0x211   :  { %v1823_v37 = vpack.c.bf16 %v1819_v35, %v1815_v34  ;;  %v1820_v38 = vsel %vm1804_vm7, %v2700_v31, %v1812_v33 }
 0x212   :  { %v1824_v40 = vpack.c.bf16 %v1820_v38, %v1816_v7  ;;  %v2373_v2 = vpop.permute.xlu0 %2372 }
 0x213   :  { %v2378_v3 = vrot.slane %v2373_v2, %v3415_v6 }
 0x214   :  { %2296 = vmatprep.mubr.bf16.mxu0 %v1824_v40 }
 0x215   :  { %2297 = vmatmul.mubr.bf16.vlgmr.msra.gmra.mrb[4].mxu0 %v1823_v37 }
 0x2e8   :  { %v2298_v48 = vpop.f32.mrb[4].mxu0 }
 0x2e9   :  { %v2701_v49 = vadd.f32 %v2298_v48, %v1894_v46  ;;  %v2300_v50 = vpop.f32.mrb[5].mxu0 }
 0x2ea   :  { %v2702_v51 = vadd.f32 %v2300_v50, %v1898_v47  ;;  %v2302_v52 = vpop.f32.mrb[6].mxu0 }
 0x2eb   :  { %v2311_v54 = vmul.f32 0.2, %v2701_v49  ;;  %v2703_v55 = vadd.f32 %v2302_v52, %v1894_v46  ;;  %v2304_v56 = vpop.f32.mrb[7].mxu0  ;;  %vm2307_vm8 = vcmp.gt.f32.partialorder %v2701_v49, 0.0 }
 0x2ec   :  { %v2312_v57 = vmul.f32 0.2, %v2702_v51  ;;  %v2704_v58 = vadd.f32 %v2304_v56, %v1898_v47  ;;  %vm2308_vm9 = vcmp.gt.f32.partialorder %v2702_v51, 0.0 }
 0x2ed   :  { %vm2309_vm10 = vcmp.gt.f32.partialorder %v2703_v55, 0.0  ;;  %v2313_v59 = vmul.f32 0.2, %v2703_v55  ;;  %v2315_v61 = vsel %vm2307_vm8, %v2701_v49, %v2311_v54 }
 0x2ee   :  { %vm2310_vm11 = vcmp.gt.f32.partialorder %v2704_v58, 0.0  ;;  %v2314_v60 = vmul.f32 0.2, %v2704_v58  ;;  %v2316_v25 = vsel %vm2308_vm9, %v2702_v51, %v2312_v57 }
 0x2ef   :  { %v2317_v62 = vsel %vm2309_vm10, %v2703_v55, %v2313_v59 }
 0x2f0   :  { %v2320_v24 = vpack.c.bf16 %v2317_v62, %v2315_v61  ;;  %v2318_v63 = vsel %vm2310_vm11, %v2704_v58, %v2314_v60 }
 0x2f1   :  { %v2321_v0 = vpack.c.bf16 %v2318_v63, %v2316_v25 }
 0x2f3   :  { %2329 = vmatprep.subr.bf16.mxu1 %v2321_v0 }
 0x2f4   :  { %2330 = vmatpush1.bf16.xpose.msra.mxu1 %v2320_v24 }
 0x2fb   :  { %2362 = vmatmul.mubr.bf16.vlgmr.msra.gmra.mrb[8].mxu1 %v2687_v1 }
 0x3ce   :  { %v2363_v4 = vpop.f32.mrb[8].mxu1 }
 0x3cf   :  { %v2379_v5 = vadd.f32 %v2378_v3, %v2363_v4  ;;  %v2365_v8 = vpop.f32.mrb[9].mxu1 }
 0x3d0   :  { %v2366_v9 = vpop.f32.mrb[10].mxu1 }
 0x3d1   :  { %v2380_v10 = vsub.f32 0.0, %v2379_v5  ;;  %v2367_v11 = vpop.f32.mrb[11].mxu1 }
 0x3d3   :  { %v2381_v12 = vmul.f32 1.442695, %v2380_v10 }
 0x3d5   :  { %3178 = vpow2.f32 %v2381_v12 }
 0x3df   :  { %v3179_v14 = vpop.eup %3178 }
 0x3e0   :  { %v2383_v15 = vadd.f32 1.0, %v3179_v14 }
 0x3e2   :  { %3180 = vrcp.f32 %v2383_v15 }
 0x3ec   :  { %v3181_v13 = vpop.eup %3180 }
 0x3ed   :  { %2386 = vst.msk [vmem:[%s3545_s7] sm:$0x1] %vm2385_vm12, %v3181_v13 }
 0x3ee   :  { %2391 = vsyncpa [#allocation4], 1 }

</bundles_post_ra>
